<compile_context>
chip_gen: v6e
topology: v6e:2x2x1
jax: 0.10.0
libtpu: 0.0.40
codegen_flags: <defaults>
</compile_context>

<pallas_src>
import functools

import jax
import jax.numpy as jnp
from jax.experimental import pallas as pl
from jax.experimental.pallas import tpu as pltpu

BN_EPS = 1e-5


def _round_up(x, m):
    return ((x + m - 1) // m) * m


# --------------------------------------------------------------------------
# Pallas GEMM kernel with fused epilogue (bias / residual / ReLU) and
# optional fused ReLU on the A operand.
# --------------------------------------------------------------------------
def _gemm_kernel(*refs, has_bias, has_res, relu_a, relu_out):
    a_ref, b_ref = refs[0], refs[1]
    idx = 2
    bias_ref = refs[idx] if has_bias else None
    idx += 1 if has_bias else 0
    res_ref = refs[idx] if has_res else None
    idx += 1 if has_res else 0
    o_ref = refs[idx]
    acc_ref = refs[idx + 1]

    @pl.when(pl.program_id(2) == 0)
    def _():
        acc_ref[...] = jnp.zeros_like(acc_ref)

    a = a_ref[...]
    if relu_a:
        a = jnp.maximum(a, 0)
    acc_ref[...] += jnp.dot(a, b_ref[...], preferred_element_type=jnp.float32)

    @pl.when(pl.program_id(2) == pl.num_programs(2) - 1)
    def _():
        out = acc_ref[...]
        if has_bias:
            out = out + bias_ref[...]
        if has_res:
            out = out + res_ref[...].astype(jnp.float32)
        if relu_out:
            out = jnp.maximum(out, 0.0)
        o_ref[...] = out.astype(o_ref.dtype)


def pallas_gemm(a, b, bias=None, residual=None, relu_a=False, relu_out=False,
                out_dtype=jnp.float32):
    """(M,K) @ (K,N) with bf16 operands, f32 accumulation and fused epilogue.

    Returns the row/column-padded (Mp, Np) result; callers slice as needed
    (padded rows/cols are exact zeros when operands are zero-padded).
    """
    M, K = a.shape
    Kb, Ncols = b.shape
    assert K == Kb, (a.shape, b.shape)

    TN = 128
    Np = _round_up(Ncols, TN)
    Kp = _round_up(K, 128)
    TK = Kp if Kp <= 512 else (512 if Kp % 512 == 0 else 128)
    if pl.cdiv(M, 512) >= 2:
        TM = 512
    elif pl.cdiv(M, 256) >= 2:
        TM = 256
    else:
        TM = _round_up(max(M, 1), 16)
    Mp = _round_up(M, TM)

    a_p = a.astype(jnp.bfloat16)
    if a_p.shape != (Mp, Kp):
        a_p = jnp.pad(a_p, ((0, Mp - M), (0, Kp - K)))
    b_p = b.astype(jnp.bfloat16)
    if b_p.shape != (Kp, Np):
        b_p = jnp.pad(b_p, ((0, Kp - K), (0, Np - Ncols)))

    operands = [a_p, b_p]
    in_specs = [
        pl.BlockSpec((TM, TK), lambda i, j, k: (i, k)),
        pl.BlockSpec((TK, TN), lambda i, j, k: (k, j)),
    ]
    has_bias = bias is not None
    has_res = residual is not None
    if has_bias:
        bias_p = bias.astype(jnp.float32).reshape(-1)
        if bias_p.shape[0] != Np:
            bias_p = jnp.pad(bias_p, (0, Np - bias_p.shape[0]))
        operands.append(bias_p.reshape(1, Np))
        in_specs.append(pl.BlockSpec((1, TN), lambda i, j, k: (0, j)))
    if has_res:
        res_p = residual
        if res_p.shape != (Mp, Np):
            res_p = jnp.pad(res_p, ((0, Mp - res_p.shape[0]),
                                    (0, Np - res_p.shape[1])))
        operands.append(res_p)
        in_specs.append(pl.BlockSpec((TM, TN), lambda i, j, k: (i, j)))

    grid = (Mp // TM, Np // TN, Kp // TK)
    out = pl.pallas_call(
        functools.partial(_gemm_kernel, has_bias=has_bias, has_res=has_res,
                          relu_a=relu_a, relu_out=relu_out),
        out_shape=jax.ShapeDtypeStruct((Mp, Np), out_dtype),
        grid_spec=pltpu.PrefetchScalarGridSpec(
            num_scalar_prefetch=0,
            grid=grid,
            in_specs=in_specs,
            out_specs=pl.BlockSpec((TM, TN), lambda i, j, k: (i, j)),
            scratch_shapes=[pltpu.VMEM((TM, TN), jnp.float32)],
        ),
        compiler_params=pltpu.CompilerParams(
            dimension_semantics=("parallel", "parallel", "arbitrary")),
    )(*operands)
    return out


# --------------------------------------------------------------------------
# Lane-dense per-column affine (+ReLU) Pallas kernel (used for BatchNorm).
# --------------------------------------------------------------------------
def _affine_kernel(x_ref, s_ref, b_ref, o_ref, *, relu):
    y = x_ref[...] * s_ref[...] + b_ref[...]
    if relu:
        y = jnp.maximum(y, 0.0)
    o_ref[...] = y.astype(o_ref.dtype)


def pallas_affine(x2d, scale_col, shift_col, relu, out_dtype=jnp.float32):
    """y = x*scale + shift (+ReLU) per column on an (M, C) slab.

    When 128 % C == 0 the slab is reshaped to 128-wide rows (scale/shift tiled
    to match) so every vector lane carries useful data.
    """
    M, C = x2d.shape
    if C < 128 and 128 % C == 0:
        g = 128 // C
        Mg = _round_up(M, 16 * g)
        xr = x2d if Mg == M else jnp.pad(x2d, ((0, Mg - M), (0, 0)))
        xr = xr.reshape(Mg // g, 128)
        s = jnp.tile(scale_col, g)
        b = jnp.tile(shift_col, g)
        lane_dense = True
    else:
        g = 1
        Cp = _round_up(C, 128)
        Mg = _round_up(M, 16)
        xr = jnp.pad(x2d, ((0, Mg - M), (0, Cp - C)))
        s = jnp.pad(scale_col, (0, Cp - C))
        b = jnp.pad(shift_col, (0, Cp - C))
        lane_dense = False

    R, L = xr.shape
    TR = R if R <= 1024 else 1024
    Rp = _round_up(R, TR)
    if Rp != R:
        xr = jnp.pad(xr, ((0, Rp - R), (0, 0)))

    out = pl.pallas_call(
        functools.partial(_affine_kernel, relu=relu),
        out_shape=jax.ShapeDtypeStruct((Rp, L), out_dtype),
        grid_spec=pltpu.PrefetchScalarGridSpec(
            num_scalar_prefetch=0,
            grid=(Rp // TR,),
            in_specs=[
                pl.BlockSpec((TR, L), lambda i: (i, 0)),
                pl.BlockSpec((1, L), lambda i: (0, 0)),
                pl.BlockSpec((1, L), lambda i: (0, 0)),
            ],
            out_specs=pl.BlockSpec((TR, L), lambda i: (i, 0)),
        ),
        compiler_params=pltpu.CompilerParams(dimension_semantics=("parallel",)),
    )(xr.astype(jnp.float32),
      s.reshape(1, L).astype(jnp.float32),
      b.reshape(1, L).astype(jnp.float32))

    if lane_dense:
        return out[:R].reshape(Mg, C)[:M]
    return out[:Mg, :C][:M]


# --------------------------------------------------------------------------
# Convolution glue: 27-tap patch slab shared by the 3x3x3 conv (pad=1) and the
# polyphase ConvTranspose3d(k=4, s=2, p=1) lowering.
# --------------------------------------------------------------------------
def _im2col27(x5d, k_pad_to):
    """3x3x3 taps of a (1,1)-padded input, as a single bf16 (M, k_pad_to) slab."""
    N, D, H, W, C = x5d.shape
    M = N * D * H * W
    xp = jnp.pad(x5d.astype(jnp.bfloat16), ((0, 0), (1, 1), (1, 1), (1, 1), (0, 0)))
    cols = []
    for a in range(3):
        for b in range(3):
            for c in range(3):
                cols.append(xp[:, a:a + D, b:b + H, c:c + W, :].reshape(M, C))
    if k_pad_to > 27 * C:
        cols.append(jnp.zeros((M, k_pad_to - 27 * C), jnp.bfloat16))
    # TODO(synk): replace this single materialized patch slab with an in-kernel
    # implicit GEMM (tap axis in the Pallas grid / manual DMA of shifted views)
    # so the 27x-expanded activations never hit HBM.
    return jnp.concatenate(cols, axis=1)


# Per-dim mapping (output parity, window offset) -> transposed-conv kernel tap.
# ConvTranspose k=4, s=2, p=1:  o = 2*i - 1 + k
#   even o = 2m : x[m]*w[1] + x[m-1]*w[3]  ->  offsets {1, 0} of the padded input
#   odd  o = 2m+1: x[m]*w[2] + x[m+1]*w[0] ->  offsets {1, 2}
_TAPK = {(0, 0): 3, (0, 1): 1, (1, 1): 2, (1, 2): 0}


def _polyphase_B(w_t):
    """Pack ConvTranspose3d weights (Cin, Cout, 4,4,4) into a (27*Cin, 8*Cout)
    GEMM operand: column group p = (pd*4 + ph*2 + pw) holds the 2x2x2 kernel
    slice for output parity (pd, ph, pw), laid on the 27-tap row structure."""
    Cin, Cout = w_t.shape[0], w_t.shape[1]
    zeros = jnp.zeros((Cin, Cout), w_t.dtype)
    parity_blocks = []
    for pd in (0, 1):
        for ph in (0, 1):
            for pw in (0, 1):
                taps = []
                for od in range(3):
                    kd = _TAPK.get((pd, od))
                    for oh in range(3):
                        kh = _TAPK.get((ph, oh))
                        for ow in range(3):
                            kw = _TAPK.get((pw, ow))
                            if kd is None or kh is None or kw is None:
                                taps.append(zeros)
                            else:
                                taps.append(w_t[:, :, kd, kh, kw])
                parity_blocks.append(jnp.concatenate(taps, axis=0))  # (27*Cin, Cout)
    return jnp.concatenate(parity_blocks, axis=1)                    # (27*Cin, 8*Cout)


def _interleave_polyphase(y2d, N, D, H, W, Cout):
    """(N*D*H*W, 8*Cout) parity-grouped GEMM output -> (N, 2D, 2H, 2W, Cout)."""
    y = y2d.reshape(N, D, H, W, 2, 2, 2, Cout)
    y = jnp.transpose(y, (0, 1, 4, 2, 5, 3, 6, 7))
    return y.reshape(N, 2 * D, 2 * H, 2 * W, Cout)


def _deconv_gemm(x5d, w_t, bias):
    """ConvTranspose3d(k=4, s=2, p=1) polyphase GEMM.  Returns the padded
    (Mp, >=8*Cout) f32 pre-interleave output (columns: parity*Cout + co)."""
    N, D, H, W, Cin = x5d.shape
    K = 27 * Cin
    Kp = _round_up(K, 128)
    A = _im2col27(x5d, k_pad_to=Kp)                       # (M, Kp) bf16
    B = jnp.pad(_polyphase_B(w_t), ((0, Kp - K), (0, 0)))  # (Kp, 8*Cout)
    bias8 = jnp.tile(bias, 8)                              # (8*Cout,)
    return pallas_gemm(A, B, bias=bias8, out_dtype=jnp.float32)


# --------------------------------------------------------------------------
# VQDecoder3D building blocks
# --------------------------------------------------------------------------
def residual_stack(x5d, res_params):
    """x = ReLU_after_stack( ... x + Conv1x1(ReLU(Conv3x3(ReLU(x)))) ... ).

    The activation is carried as a lane-padded (M, 128) f32 slab; the leading
    ReLU is fused into the 3x3x3 GEMM (relu_a), the inter-conv ReLU into its
    epilogue, and the stack's final ReLU into the last 1x1x1 GEMM epilogue.
    """
    N, D, H, W, C = x5d.shape
    M = N * D * H * W
    x_pad = jnp.pad(x5d.reshape(M, C).astype(jnp.float32), ((0, 0), (0, 128 - C)))
    n_layers = len(res_params)
    K1 = 27 * C
    K1p = _round_up(K1, 128)
    for li, p in enumerate(res_params):
        res_h = p["w1"].shape[-1]
        x5 = x_pad[:M, :C].reshape(N, D, H, W, C)
        # Conv3d 3x3x3 (bias-free): fused leading ReLU (on A) + trailing ReLU.
        A1 = _im2col27(x5, k_pad_to=K1p)
        B1 = jnp.pad(p["w1"].reshape(K1, res_h),
                     ((0, K1p - K1), (0, 128 - res_h)))
        h = pallas_gemm(A1, B1, relu_a=True, relu_out=True,
                        out_dtype=jnp.bfloat16)            # (Mp, 128) bf16
        # Conv3d 1x1x1 (bias-free) + fused residual add (+ final stack ReLU).
        B2 = jnp.pad(p["w2"], ((0, 128 - res_h), (0, 128 - C)))
        x_pad = pallas_gemm(h, B2, residual=x_pad,
                            relu_out=(li == n_layers - 1),
                            out_dtype=jnp.float32)         # (Mp, 128) f32
    return x_pad[:M, :C].reshape(N, D, H, W, C)


def init_params(key, in_dim, out_dim, num_reslayers):
    ks = jax.random.split(key, 2 * num_reslayers + 4)
    params = {"res": []}
    i = 0
    res_h = in_dim // 2
    for _ in range(num_reslayers):
        w1 = jax.random.normal(ks[i], (3, 3, 3, in_dim, res_h), jnp.float32) * 0.1
        w2 = jax.random.normal(ks[i + 1], (res_h, in_dim), jnp.float32) * 0.1
        params["res"].append({"w1": w1, "w2": w2})
        i += 2
    params["deconv1_w"] = jax.random.normal(ks[i], (in_dim, out_dim, 4, 4, 4), jnp.float32) * 0.1
    params["deconv1_b"] = jax.random.normal(ks[i + 1], (out_dim,), jnp.float32) * 0.1
    params["bn1_gamma"] = jnp.ones((out_dim,), jnp.float32)    # PyTorch BN default init
    params["bn1_beta"] = jnp.zeros((out_dim,), jnp.float32)
    params["deconv2_w"] = jax.random.normal(ks[i + 2], (out_dim, out_dim, 4, 4, 4), jnp.float32) * 0.1
    params["deconv2_b"] = jax.random.normal(ks[i + 3], (out_dim,), jnp.float32) * 0.1
    return params


def vq_decoder3d_forward(x_ncdhw, params):
    # NCDHW -> NDHWC
    x = jnp.transpose(x_ncdhw, (0, 2, 3, 4, 1)).astype(jnp.float32)

    # residual stack
    x = residual_stack(x, params["res"])

    # ---- deconv block 1: ConvTranspose3d + BatchNorm3d + ReLU ----
    N, D, H, W, _ = x.shape
    Cout = params["deconv1_w"].shape[1]
    M = N * D * H * W
    y = _deconv_gemm(x, params["deconv1_w"], params["deconv1_b"])   # (Mp, 128) f32
    y64 = y[:M, :8 * Cout]                                          # (M, 8*Cout)

    # TODO(synk): per-channel BN batch statistics are a tiny fused XLA
    # reduction here; normalization + ReLU runs in the lane-dense Pallas
    # affine kernel (a fully fused stats epilogue inside the GEMM would race
    # across megacore-parallel M blocks).
    cnt = jnp.float32(M * 8)
    s1 = jnp.sum(y64, axis=0).reshape(8, Cout).sum(axis=0)
    s2 = jnp.sum(y64 * y64, axis=0).reshape(8, Cout).sum(axis=0)
    mean = s1 / cnt
    var = jnp.maximum(s2 / cnt - mean * mean, 0.0)                  # biased var
    scale_c = params["bn1_gamma"] / jnp.sqrt(var + BN_EPS)
    shift_c = params["bn1_beta"] - mean * scale_c
    scale_col = jnp.tile(scale_c, 8)                                # per GEMM column
    shift_col = jnp.tile(shift_c, 8)
    y64 = pallas_affine(y64, scale_col, shift_col, relu=True,
                        out_dtype=jnp.bfloat16)
    x = _interleave_polyphase(y64, N, D, H, W, Cout)                # (N,2D,2H,2W,Cout)

    # ---- deconv block 2 (final): ConvTranspose3d only ----
    N2, D2, H2, W2, _ = x.shape
    Cout2 = params["deconv2_w"].shape[1]
    M2 = N2 * D2 * H2 * W2
    y = _deconv_gemm(x, params["deconv2_w"], params["deconv2_b"])
    y = _interleave_polyphase(y[:M2, :8 * Cout2], N2, D2, H2, W2, Cout2)

    # NDHWC -> NCDHW
    return jnp.transpose(y, (0, 4, 1, 2, 3))


# --------------------------------------------------------------------------
if __name__ == "__main__":
    in_dim, hidden_dim, out_dim = 8, 16, 8   # top->bottom path needs in_dim == out_dim
    num_reslayers = 1
    N, D, H, W = 2, 2, 4, 4

    key = jax.random.PRNGKey(0)
    k_x, k_p = jax.random.split(key)
    x = jax.random.normal(k_x, (N, in_dim, D, H, W), jnp.float32)   # NCDHW like PyTorch
    params = init_params(k_p, in_dim, out_dim, num_reslayers)

    fwd = jax.jit(vq_decoder3d_forward)
    y = fwd(x, params)
    jax.block_until_ready(y)

    expected = (N, out_dim, 4 * D, 4 * H, 4 * W)
    assert y.shape == expected, (y.shape, expected)
    assert bool(jnp.all(jnp.isfinite(y)))
    print("KERNEL_OK")
</pallas_src>

<mosaic_0001>
module attributes {stable_mosaic.version = 11 : i64} {
  func.func @_gemm_kernel(%arg0: i32, %arg1: i32, %arg2: i32, %arg3: memref<64x256xbf16, #tpu.memory_space<vmem>>, %arg4: memref<256x128xbf16, #tpu.memory_space<vmem>>, %arg5: memref<64x128xbf16, #tpu.memory_space<vmem>>, %arg6: memref<64x128xf32, #tpu.memory_space<vmem>>) attributes {dimension_semantics = [#tpu.dimension_semantics<parallel>, #tpu.dimension_semantics<parallel>, #tpu.dimension_semantics<arbitrary>], iteration_bounds = array<i64: 1, 1, 1>, scalar_prefetch = 0 : i64, scratch_operands = 1 : i64, tpu.core_type = #tpu.core_type<tc>, window_params = [{transform_indices = @transform_0, window_bounds = array<i64: 64, 256>}, {transform_indices = @transform_1, window_bounds = array<i64: 256, 128>}, {transform_indices = @transform_2, window_bounds = array<i64: 64, 128>}]} {
    %c0_i32 = arith.constant 0 : i32
    %0 = arith.cmpi eq, %arg2, %c0_i32 : i32
    %1 = arith.extui %0 : i1 to i32
    %c0_i32_0 = arith.constant 0 : i32
    %2 = arith.cmpi ne, %1, %c0_i32_0 : i32
    scf.if %2 {
      %cst_11 = arith.constant 0.000000e+00 : f32
      %14 = vector.broadcast %cst_11 : f32 to vector<64x128xf32>
      %c0_12 = arith.constant 0 : index
      %c0_13 = arith.constant 0 : index
      %15 = vector.load %arg6[%c0_12, %c0_13] : memref<64x128xf32, #tpu.memory_space<vmem>>, vector<64x128xf32>
      tpu.vector_store %arg6[%c0_12, %c0_13], %14 {strides = array<i32>} : memref<64x128xf32, #tpu.memory_space<vmem>>, vector<64x128xf32>,
    } else {
    }
    %c0 = arith.constant 0 : index
    %c0_1 = arith.constant 0 : index
    %3 = vector.load %arg3[%c0, %c0_1] : memref<64x256xbf16, #tpu.memory_space<vmem>>, vector<64x256xbf16>
    %cst = arith.constant 0.000000e+00 : bf16
    %4 = vector.broadcast %cst : bf16 to vector<64x256xbf16>
    %5 = arith.maximumf %3, %4 : vector<64x256xbf16>
    %c0_2 = arith.constant 0 : index
    %c0_3 = arith.constant 0 : index
    %6 = vector.load %arg6[%c0_2, %c0_3] : memref<64x128xf32, #tpu.memory_space<vmem>>, vector<64x128xf32>
    %c0_4 = arith.constant 0 : index
    %c0_5 = arith.constant 0 : index
    %7 = vector.load %arg4[%c0_4, %c0_5] : memref<256x128xbf16, #tpu.memory_space<vmem>>, vector<256x128xbf16>
    %cst_6 = arith.constant dense<0.000000e+00> : vector<64x128xf32>
    %8 = tpu.matmul %5, %7, %cst_6 {dimension_numbers = #tpu.dot_dimension_numbers<[1], [0], [0], [1], [0, 0, 1, 1], [], []>} : vector<64x256xbf16>, vector<256x128xbf16>, vector<64x128xf32> -> vector<64x128xf32>
    %9 = arith.addf %6, %8 : vector<64x128xf32>
    %c0_7 = arith.constant 0 : index
    %c0_8 = arith.constant 0 : index
    %10 = vector.load %arg6[%c0_7, %c0_8] : memref<64x128xf32, #tpu.memory_space<vmem>>, vector<64x128xf32>
    tpu.vector_store %arg6[%c0_7, %c0_8], %9 {strides = array<i32>} : memref<64x128xf32, #tpu.memory_space<vmem>>, vector<64x128xf32>,
    %c0_i32_9 = arith.constant 0 : i32
    %11 = arith.cmpi eq, %arg2, %c0_i32_9 : i32
    %12 = arith.extui %11 : i1 to i32
    %c0_i32_10 = arith.constant 0 : i32
    %13 = arith.cmpi ne, %12, %c0_i32_10 : i32
    scf.if %13 {
      %c0_11 = arith.constant 0 : index
      %c0_12 = arith.constant 0 : index
      %14 = vector.load %arg6[%c0_11, %c0_12] : memref<64x128xf32, #tpu.memory_space<vmem>>, vector<64x128xf32>
      %cst_13 = arith.constant 0.000000e+00 : f32
      %15 = vector.broadcast %cst_13 : f32 to vector<64x128xf32>
      %16 = arith.maximumf %14, %15 : vector<64x128xf32>
      %17 = arith.truncf %16 : vector<64x128xf32> to vector<64x128xbf16>
      %c0_14 = arith.constant 0 : index
      %c0_15 = arith.constant 0 : index
      %18 = vector.load %arg5[%c0_14, %c0_15] : memref<64x128xbf16, #tpu.memory_space<vmem>>, vector<64x128xbf16>
      tpu.vector_store %arg5[%c0_14, %c0_15], %17 {strides = array<i32>} : memref<64x128xbf16, #tpu.memory_space<vmem>>, vector<64x128xbf16>,
    } else {
    }
    return
  }
  func.func @transform_0(%arg0: i32, %arg1: i32, %arg2: i32) -> (i32, i32) {
    %c0_i32 = arith.constant 0 : i32
    return %arg0, %arg2 : i32, i32
  }
  func.func @transform_1(%arg0: i32, %arg1: i32, %arg2: i32) -> (i32, i32) {
    %c0_i32 = arith.constant 0 : i32
    return %arg2, %arg1 : i32, i32
  }
  func.func @transform_2(%arg0: i32, %arg1: i32, %arg2: i32) -> (i32, i32) {
    %c0_i32 = arith.constant 0 : i32
    return %arg0, %arg1 : i32, i32
  }
}

module attributes {stable_mosaic.version = 11 : i64} {
  func.func @_gemm_kernel(%arg0: i32, %arg1: i32, %arg2: i32, %arg3: memref<64x128xbf16, #tpu.memory_space<vmem>>, %arg4: memref<128x128xbf16, #tpu.memory_space<vmem>>, %arg5: memref<64x128xf32, #tpu.memory_space<vmem>>, %arg6: memref<64x128xf32, #tpu.memory_space<vmem>>, %arg7: memref<64x128xf32, #tpu.memory_space<vmem>>) attributes {dimension_semantics = [#tpu.dimension_semantics<parallel>, #tpu.dimension_semantics<parallel>, #tpu.dimension_semantics<arbitrary>], iteration_bounds = array<i64: 1, 1, 1>, scalar_prefetch = 0 : i64, scratch_operands = 1 : i64, tpu.core_type = #tpu.core_type<tc>, window_params = [{transform_indices = @transform_0, window_bounds = array<i64: 64, 128>}, {transform_indices = @transform_1, window_bounds = array<i64: 128, 128>}, {transform_indices = @transform_2, window_bounds = array<i64: 64, 128>}, {transform_indices = @transform_3, window_bounds = array<i64: 64, 128>}]} {
    %c0_i32 = arith.constant 0 : i32
    %0 = arith.cmpi eq, %arg2, %c0_i32 : i32
    %1 = arith.extui %0 : i1 to i32
    %c0_i32_0 = arith.constant 0 : i32
    %2 = arith.cmpi ne, %1, %c0_i32_0 : i32
    scf.if %2 {
      %cst_10 = arith.constant 0.000000e+00 : f32
      %12 = vector.broadcast %cst_10 : f32 to vector<64x128xf32>
      %c0_11 = arith.constant 0 : index
      %c0_12 = arith.constant 0 : index
      %13 = vector.load %arg7[%c0_11, %c0_12] : memref<64x128xf32, #tpu.memory_space<vmem>>, vector<64x128xf32>
      tpu.vector_store %arg7[%c0_11, %c0_12], %12 {strides = array<i32>} : memref<64x128xf32, #tpu.memory_space<vmem>>, vector<64x128xf32>,
    } else {
    }
    %c0 = arith.constant 0 : index
    %c0_1 = arith.constant 0 : index
    %3 = vector.load %arg3[%c0, %c0_1] : memref<64x128xbf16, #tpu.memory_space<vmem>>, vector<64x128xbf16>
    %c0_2 = arith.constant 0 : index
    %c0_3 = arith.constant 0 : index
    %4 = vector.load %arg7[%c0_2, %c0_3] : memref<64x128xf32, #tpu.memory_space<vmem>>, vector<64x128xf32>
    %c0_4 = arith.constant 0 : index
    %c0_5 = arith.constant 0 : index
    %5 = vector.load %arg4[%c0_4, %c0_5] : memref<128x128xbf16, #tpu.memory_space<vmem>>, vector<128x128xbf16>
    %cst = arith.constant dense<0.000000e+00> : vector<64x128xf32>
    %6 = tpu.matmul %3, %5, %cst {dimension_numbers = #tpu.dot_dimension_numbers<[1], [0], [0], [1], [0, 0, 1, 1], [], []>} : vector<64x128xbf16>, vector<128x128xbf16>, vector<64x128xf32> -> vector<64x128xf32>
    %7 = arith.addf %4, %6 : vector<64x128xf32>
    %c0_6 = arith.constant 0 : index
    %c0_7 = arith.constant 0 : index
    %8 = vector.load %arg7[%c0_6, %c0_7] : memref<64x128xf32, #tpu.memory_space<vmem>>, vector<64x128xf32>
    tpu.vector_store %arg7[%c0_6, %c0_7], %7 {strides = array<i32>} : memref<64x128xf32, #tpu.memory_space<vmem>>, vector<64x128xf32>,
    %c0_i32_8 = arith.constant 0 : i32
    %9 = arith.cmpi eq, %arg2, %c0_i32_8 : i32
    %10 = arith.extui %9 : i1 to i32
    %c0_i32_9 = arith.constant 0 : i32
    %11 = arith.cmpi ne, %10, %c0_i32_9 : i32
    scf.if %11 {
      %c0_10 = arith.constant 0 : index
      %c0_11 = arith.constant 0 : index
      %12 = vector.load %arg7[%c0_10, %c0_11] : memref<64x128xf32, #tpu.memory_space<vmem>>, vector<64x128xf32>
      %c0_12 = arith.constant 0 : index
      %c0_13 = arith.constant 0 : index
      %13 = vector.load %arg5[%c0_12, %c0_13] : memref<64x128xf32, #tpu.memory_space<vmem>>, vector<64x128xf32>
      %14 = arith.addf %12, %13 : vector<64x128xf32>
      %cst_14 = arith.constant 0.000000e+00 : f32
      %15 = vector.broadcast %cst_14 : f32 to vector<64x128xf32>
      %16 = arith.maximumf %14, %15 : vector<64x128xf32>
      %c0_15 = arith.constant 0 : index
      %c0_16 = arith.constant 0 : index
      %17 = vector.load %arg6[%c0_15, %c0_16] : memref<64x128xf32, #tpu.memory_space<vmem>>, vector<64x128xf32>
      tpu.vector_store %arg6[%c0_15, %c0_16], %16 {strides = array<i32>} : memref<64x128xf32, #tpu.memory_space<vmem>>, vector<64x128xf32>,
    } else {
    }
    return
  }
  func.func @transform_0(%arg0: i32, %arg1: i32, %arg2: i32) -> (i32, i32) {
    %c0_i32 = arith.constant 0 : i32
    return %arg0, %arg2 : i32, i32
  }
  func.func @transform_1(%arg0: i32, %arg1: i32, %arg2: i32) -> (i32, i32) {
    %c0_i32 = arith.constant 0 : i32
    return %arg2, %arg1 : i32, i32
  }
  func.func @transform_2(%arg0: i32, %arg1: i32, %arg2: i32) -> (i32, i32) {
    %c0_i32 = arith.constant 0 : i32
    return %arg0, %arg1 : i32, i32
  }
  func.func @transform_3(%arg0: i32, %arg1: i32, %arg2: i32) -> (i32, i32) {
    %c0_i32 = arith.constant 0 : i32
    return %arg0, %arg1 : i32, i32
  }
}

module attributes {stable_mosaic.version = 11 : i64} {
  func.func @_gemm_kernel(%arg0: i32, %arg1: i32, %arg2: i32, %arg3: memref<64x256xbf16, #tpu.memory_space<vmem>>, %arg4: memref<256x128xbf16, #tpu.memory_space<vmem>>, %arg5: memref<1x128xf32, #tpu.memory_space<vmem>>, %arg6: memref<64x128xf32, #tpu.memory_space<vmem>>, %arg7: memref<64x128xf32, #tpu.memory_space<vmem>>) attributes {dimension_semantics = [#tpu.dimension_semantics<parallel>, #tpu.dimension_semantics<parallel>, #tpu.dimension_semantics<arbitrary>], iteration_bounds = array<i64: 1, 1, 1>, scalar_prefetch = 0 : i64, scratch_operands = 1 : i64, tpu.core_type = #tpu.core_type<tc>, window_params = [{transform_indices = @transform_0, window_bounds = array<i64: 64, 256>}, {transform_indices = @transform_1, window_bounds = array<i64: 256, 128>}, {transform_indices = @transform_2, window_bounds = array<i64: 1, 128>}, {transform_indices = @transform_3, window_bounds = array<i64: 64, 128>}]} {
    %c0_i32 = arith.constant 0 : i32
    %0 = arith.cmpi eq, %arg2, %c0_i32 : i32
    %1 = arith.extui %0 : i1 to i32
    %c0_i32_0 = arith.constant 0 : i32
    %2 = arith.cmpi ne, %1, %c0_i32_0 : i32
    scf.if %2 {
      %cst_10 = arith.constant 0.000000e+00 : f32
      %12 = vector.broadcast %cst_10 : f32 to vector<64x128xf32>
      %c0_11 = arith.constant 0 : index
      %c0_12 = arith.constant 0 : index
      %13 = vector.load %arg7[%c0_11, %c0_12] : memref<64x128xf32, #tpu.memory_space<vmem>>, vector<64x128xf32>
      tpu.vector_store %arg7[%c0_11, %c0_12], %12 {strides = array<i32>} : memref<64x128xf32, #tpu.memory_space<vmem>>, vector<64x128xf32>,
    } else {
    }
    %c0 = arith.constant 0 : index
    %c0_1 = arith.constant 0 : index
    %3 = vector.load %arg3[%c0, %c0_1] : memref<64x256xbf16, #tpu.memory_space<vmem>>, vector<64x256xbf16>
    %c0_2 = arith.constant 0 : index
    %c0_3 = arith.constant 0 : index
    %4 = vector.load %arg7[%c0_2, %c0_3] : memref<64x128xf32, #tpu.memory_space<vmem>>, vector<64x128xf32>
    %c0_4 = arith.constant 0 : index
    %c0_5 = arith.constant 0 : index
    %5 = vector.load %arg4[%c0_4, %c0_5] : memref<256x128xbf16, #tpu.memory_space<vmem>>, vector<256x128xbf16>
    %cst = arith.constant dense<0.000000e+00> : vector<64x128xf32>
    %6 = tpu.matmul %3, %5, %cst {dimension_numbers = #tpu.dot_dimension_numbers<[1], [0], [0], [1], [0, 0, 1, 1], [], []>} : vector<64x256xbf16>, vector<256x128xbf16>, vector<64x128xf32> -> vector<64x128xf32>
    %7 = arith.addf %4, %6 : vector<64x128xf32>
    %c0_6 = arith.constant 0 : index
    %c0_7 = arith.constant 0 : index
    %8 = vector.load %arg7[%c0_6, %c0_7] : memref<64x128xf32, #tpu.memory_space<vmem>>, vector<64x128xf32>
    tpu.vector_store %arg7[%c0_6, %c0_7], %7 {strides = array<i32>} : memref<64x128xf32, #tpu.memory_space<vmem>>, vector<64x128xf32>,
    %c0_i32_8 = arith.constant 0 : i32
    %9 = arith.cmpi eq, %arg2, %c0_i32_8 : i32
    %10 = arith.extui %9 : i1 to i32
    %c0_i32_9 = arith.constant 0 : i32
    %11 = arith.cmpi ne, %10, %c0_i32_9 : i32
    scf.if %11 {
      %c0_10 = arith.constant 0 : index
      %c0_11 = arith.constant 0 : index
      %12 = vector.load %arg7[%c0_10, %c0_11] : memref<64x128xf32, #tpu.memory_space<vmem>>, vector<64x128xf32>
      %c0_12 = arith.constant 0 : index
      %c0_13 = arith.constant 0 : index
      %13 = vector.load %arg5[%c0_12, %c0_13] : memref<1x128xf32, #tpu.memory_space<vmem>>, vector<1x128xf32>
      %14 = vector.broadcast %13 : vector<1x128xf32> to vector<64x128xf32>
      %15 = arith.addf %12, %14 : vector<64x128xf32>
      %c0_14 = arith.constant 0 : index
      %c0_15 = arith.constant 0 : index
      %16 = vector.load %arg6[%c0_14, %c0_15] : memref<64x128xf32, #tpu.memory_space<vmem>>, vector<64x128xf32>
      tpu.vector_store %arg6[%c0_14, %c0_15], %15 {strides = array<i32>} : memref<64x128xf32, #tpu.memory_space<vmem>>, vector<64x128xf32>,
    } else {
    }
    return
  }
  func.func @transform_0(%arg0: i32, %arg1: i32, %arg2: i32) -> (i32, i32) {
    %c0_i32 = arith.constant 0 : i32
    return %arg0, %arg2 : i32, i32
  }
  func.func @transform_1(%arg0: i32, %arg1: i32, %arg2: i32) -> (i32, i32) {
    %c0_i32 = arith.constant 0 : i32
    return %arg2, %arg1 : i32, i32
  }
  func.func @transform_2(%arg0: i32, %arg1: i32, %arg2: i32) -> (i32, i32) {
    %c0_i32 = arith.constant 0 : i32
    %c0_i32_0 = arith.constant 0 : i32
    return %c0_i32, %arg1 : i32, i32
  }
  func.func @transform_3(%arg0: i32, %arg1: i32, %arg2: i32) -> (i32, i32) {
    %c0_i32 = arith.constant 0 : i32
    return %arg0, %arg1 : i32, i32
  }
}

module attributes {stable_mosaic.version = 11 : i64} {
  func.func @_affine_kernel(%arg0: i32, %arg1: memref<32x128xf32, #tpu.memory_space<vmem>>, %arg2: memref<1x128xf32, #tpu.memory_space<vmem>>, %arg3: memref<1x128xf32, #tpu.memory_space<vmem>>, %arg4: memref<32x128xbf16, #tpu.memory_space<vmem>>) attributes {dimension_semantics = [#tpu.dimension_semantics<parallel>], iteration_bounds = array<i64: 1>, scalar_prefetch = 0 : i64, scratch_operands = 0 : i64, tpu.core_type = #tpu.core_type<tc>, window_params = [{transform_indices = @transform_0, window_bounds = array<i64: 32, 128>}, {pipeline_mode = #tpu.pipeline_mode<synchronous>, transform_indices = @transform_1, window_bounds = array<i64: 1, 128>}, {pipeline_mode = #tpu.pipeline_mode<synchronous>, transform_indices = @transform_2, window_bounds = array<i64: 1, 128>}, {transform_indices = @transform_3, window_bounds = array<i64: 32, 128>}]} {
    %c0 = arith.constant 0 : index
    %c0_0 = arith.constant 0 : index
    %0 = vector.load %arg1[%c0, %c0_0] : memref<32x128xf32, #tpu.memory_space<vmem>>, vector<32x128xf32>
    %c0_1 = arith.constant 0 : index
    %c0_2 = arith.constant 0 : index
    %1 = vector.load %arg2[%c0_1, %c0_2] : memref<1x128xf32, #tpu.memory_space<vmem>>, vector<1x128xf32>
    %2 = vector.broadcast %1 : vector<1x128xf32> to vector<32x128xf32>
    %3 = arith.mulf %0, %2 : vector<32x128xf32>
    %c0_3 = arith.constant 0 : index
    %c0_4 = arith.constant 0 : index
    %4 = vector.load %arg3[%c0_3, %c0_4] : memref<1x128xf32, #tpu.memory_space<vmem>>, vector<1x128xf32>
    %5 = vector.broadcast %4 : vector<1x128xf32> to vector<32x128xf32>
    %6 = arith.addf %3, %5 : vector<32x128xf32>
    %cst = arith.constant 0.000000e+00 : f32
    %7 = vector.broadcast %cst : f32 to vector<32x128xf32>
    %8 = arith.maximumf %6, %7 : vector<32x128xf32>
    %9 = arith.truncf %8 : vector<32x128xf32> to vector<32x128xbf16>
    %c0_5 = arith.constant 0 : index
    %c0_6 = arith.constant 0 : index
    %10 = vector.load %arg4[%c0_5, %c0_6] : memref<32x128xbf16, #tpu.memory_space<vmem>>, vector<32x128xbf16>
    tpu.vector_store %arg4[%c0_5, %c0_6], %9 {strides = array<i32>} : memref<32x128xbf16, #tpu.memory_space<vmem>>, vector<32x128xbf16>,
    return
  }
  func.func @transform_0(%arg0: i32) -> (i32, i32) {
    %c0_i32 = arith.constant 0 : i32
    %c0_i32_0 = arith.constant 0 : i32
    return %arg0, %c0_i32 : i32, i32
  }
  func.func @transform_1(%arg0: i32) -> (i32, i32) {
    %c0_i32 = arith.constant 0 : i32
    %c0_i32_0 = arith.constant 0 : i32
    %c0_i32_1 = arith.constant 0 : i32
    return %c0_i32, %c0_i32_0 : i32, i32
  }
  func.func @transform_2(%arg0: i32) -> (i32, i32) {
    %c0_i32 = arith.constant 0 : i32
    %c0_i32_0 = arith.constant 0 : i32
    %c0_i32_1 = arith.constant 0 : i32
    return %c0_i32, %c0_i32_0 : i32, i32
  }
  func.func @transform_3(%arg0: i32) -> (i32, i32) {
    %c0_i32 = arith.constant 0 : i32
    %c0_i32_0 = arith.constant 0 : i32
    return %arg0, %c0_i32 : i32, i32
  }
}

module attributes {stable_mosaic.version = 11 : i64} {
  func.func @_gemm_kernel(%arg0: i32, %arg1: i32, %arg2: i32, %arg3: memref<256x256xbf16, #tpu.memory_space<vmem>>, %arg4: memref<256x128xbf16, #tpu.memory_space<vmem>>, %arg5: memref<1x128xf32, #tpu.memory_space<vmem>>, %arg6: memref<256x128xf32, #tpu.memory_space<vmem>>, %arg7: memref<256x128xf32, #tpu.memory_space<vmem>>) attributes {dimension_semantics = [#tpu.dimension_semantics<parallel>, #tpu.dimension_semantics<parallel>, #tpu.dimension_semantics<arbitrary>], iteration_bounds = array<i64: 2, 1, 1>, scalar_prefetch = 0 : i64, scratch_operands = 1 : i64, tpu.core_type = #tpu.core_type<tc>, window_params = [{transform_indices = @transform_0, window_bounds = array<i64: 256, 256>}, {transform_indices = @transform_1, window_bounds = array<i64: 256, 128>}, {transform_indices = @transform_2, window_bounds = array<i64: 1, 128>}, {transform_indices = @transform_3, window_bounds = array<i64: 256, 128>}]} {
    %c0_i32 = arith.constant 0 : i32
    %0 = arith.cmpi eq, %arg2, %c0_i32 : i32
    %1 = arith.extui %0 : i1 to i32
    %c0_i32_0 = arith.constant 0 : i32
    %2 = arith.cmpi ne, %1, %c0_i32_0 : i32
    scf.if %2 {
      %cst_10 = arith.constant 0.000000e+00 : f32
      %12 = vector.broadcast %cst_10 : f32 to vector<256x128xf32>
      %c0_11 = arith.constant 0 : index
      %c0_12 = arith.constant 0 : index
      %13 = vector.load %arg7[%c0_11, %c0_12] : memref<256x128xf32, #tpu.memory_space<vmem>>, vector<256x128xf32>
      tpu.vector_store %arg7[%c0_11, %c0_12], %12 {strides = array<i32>} : memref<256x128xf32, #tpu.memory_space<vmem>>, vector<256x128xf32>,
    } else {
    }
    %c0 = arith.constant 0 : index
    %c0_1 = arith.constant 0 : index
    %3 = vector.load %arg3[%c0, %c0_1] : memref<256x256xbf16, #tpu.memory_space<vmem>>, vector<256x256xbf16>
    %c0_2 = arith.constant 0 : index
    %c0_3 = arith.constant 0 : index
    %4 = vector.load %arg7[%c0_2, %c0_3] : memref<256x128xf32, #tpu.memory_space<vmem>>, vector<256x128xf32>
    %c0_4 = arith.constant 0 : index
    %c0_5 = arith.constant 0 : index
    %5 = vector.load %arg4[%c0_4, %c0_5] : memref<256x128xbf16, #tpu.memory_space<vmem>>, vector<256x128xbf16>
    %cst = arith.constant dense<0.000000e+00> : vector<256x128xf32>
    %6 = tpu.matmul %3, %5, %cst {dimension_numbers = #tpu.dot_dimension_numbers<[1], [0], [0], [1], [0, 0, 1, 1], [], []>} : vector<256x256xbf16>, vector<256x128xbf16>, vector<256x128xf32> -> vector<256x128xf32>
    %7 = arith.addf %4, %6 : vector<256x128xf32>
    %c0_6 = arith.constant 0 : index
    %c0_7 = arith.constant 0 : index
    %8 = vector.load %arg7[%c0_6, %c0_7] : memref<256x128xf32, #tpu.memory_space<vmem>>, vector<256x128xf32>
    tpu.vector_store %arg7[%c0_6, %c0_7], %7 {strides = array<i32>} : memref<256x128xf32, #tpu.memory_space<vmem>>, vector<256x128xf32>,
    %c0_i32_8 = arith.constant 0 : i32
    %9 = arith.cmpi eq, %arg2, %c0_i32_8 : i32
    %10 = arith.extui %9 : i1 to i32
    %c0_i32_9 = arith.constant 0 : i32
    %11 = arith.cmpi ne, %10, %c0_i32_9 : i32
    scf.if %11 {
      %c0_10 = arith.constant 0 : index
      %c0_11 = arith.constant 0 : index
      %12 = vector.load %arg7[%c0_10, %c0_11] : memref<256x128xf32, #tpu.memory_space<vmem>>, vector<256x128xf32>
      %c0_12 = arith.constant 0 : index
      %c0_13 = arith.constant 0 : index
      %13 = vector.load %arg5[%c0_12, %c0_13] : memref<1x128xf32, #tpu.memory_space<vmem>>, vector<1x128xf32>
      %14 = vector.broadcast %13 : vector<1x128xf32> to vector<256x128xf32>
      %15 = arith.addf %12, %14 : vector<256x128xf32>
      %c0_14 = arith.constant 0 : index
      %c0_15 = arith.constant 0 : index
      %16 = vector.load %arg6[%c0_14, %c0_15] : memref<256x128xf32, #tpu.memory_space<vmem>>, vector<256x128xf32>
      tpu.vector_store %arg6[%c0_14, %c0_15], %15 {strides = array<i32>} : memref<256x128xf32, #tpu.memory_space<vmem>>, vector<256x128xf32>,
    } else {
    }
    return
  }
  func.func @transform_0(%arg0: i32, %arg1: i32, %arg2: i32) -> (i32, i32) {
    %c0_i32 = arith.constant 0 : i32
    return %arg0, %arg2 : i32, i32
  }
  func.func @transform_1(%arg0: i32, %arg1: i32, %arg2: i32) -> (i32, i32) {
    %c0_i32 = arith.constant 0 : i32
    return %arg2, %arg1 : i32, i32
  }
  func.func @transform_2(%arg0: i32, %arg1: i32, %arg2: i32) -> (i32, i32) {
    %c0_i32 = arith.constant 0 : i32
    %c0_i32_0 = arith.constant 0 : i32
    return %c0_i32, %arg1 : i32, i32
  }
  func.func @transform_3(%arg0: i32, %arg1: i32, %arg2: i32) -> (i32, i32) {
    %c0_i32 = arith.constant 0 : i32
    return %arg0, %arg1 : i32, i32
  }
}

</mosaic_0001>

<bundles_post_ra>
// kernel: tile.31
= control target key start
LH: loop header
LB: loop body
LE: loop exit
PB: predicated region body
PF: predicated region fallthrough
CT: control target
= control target key end

     0   :  { %2 = vsyncpa [#allocation1], 0  ;;  %s42_s6 = smov [#allocation0]   ;;  %s59_s0 = inlined_call_operand.hbm [shape: f32[8], index: 0, kind: input, shape index: {}]   ;;  %s60_s1 = inlined_call_operand.vmem [shape: f32[8,8], index: 1, kind: output, shape index: {}]  }
   0x1   :  { %s9_s7 = sshll.u32 %s42_s6, 4  ;;  %s10_s7 = int_to_ptr.vmem [resolvable:$true] %s9_s7 }
   0x2   :  { %s28_s8 = scalar_lea.vmem %s10_s7, 16  ;;  %s32_s9 = scalar_lea.vmem %s10_s7, 32 }
   0x3   :  { %p29_p0 = scmp.ne.s32.totalorder %s10_s7, %s28_s8  ;;  %p33_p1 = scmp.lt.s32.totalorder %s10_s7, %s10_s7 }
   0x4   :  { %p34_p2 = scmp.lt.s32.totalorder %s32_s9, %s28_s8 }
   0x6   :  { %p35_p3 = por %p34_p2, %p33_p1 }
   0x8   :  { %p36_p4 = pnand %p35_p3, %p29_p0 }
   0xa   :  { %39 = shalt.err (!%p36_p4)
}
   0xb   :  { %12 = dma.hbm_to_vmem [thread:$0]  %s59_s0, 16, %s10_s7, [#allocation1]  }
   0xc   :  { %40 = dma.done.wait [#allocation1], 16  }
   0xd   :  { %41 = vsyncadd [#allocation1], 4294967280  ;;  %v16_v0 = vld [vmem:[#allocation0] ss:$0 sm:$0xff] }
   0xe   :  { %17 = vst [vmem:[%s60_s1] sm:$0xff] %v16_v0 }
   0xf   :  { %18 = vsyncpa [#allocation1], 1 }

// kernel: tile.32
= control target key start
LH: loop header
LB: loop body
LE: loop exit
PB: predicated region body
PF: predicated region fallthrough
CT: control target
= control target key end

     0   :  { %s69_s10 = smov 56   ;;  %s70_s11 = smov 40   ;;  %vm3_vm0 = vcmask 64512   ;;  %vm9_vm1 = vcmask 523712   ;;  %vm15_vm2 = vcmask 458112   ;;  %vm21_vm3 = vcmask 392512   ;;  %s113_s0 = inlined_call_operand.vmem [shape: f32[8,8], index: 0, kind: input, shape index: {}]   ;;  %s114_s1 = inlined_call_operand.vmem [shape: f32[64], index: 1, kind: output, shape index: {}]  }
   0x1   :  { %v55_v0 = vld [vmem:[%s113_s0 + $0x7] sm:$0x1]   ;;  %v57_v1 = vld [vmem:[%s113_s0 + $0x5] sm:$0x1]   ;;  %v56_v2 = vld [vmem:[%s113_s0 + $0x6] sm:$0x1]  }
   0x2   :  { %7 = vrot.lane.b32.xlu0 %v55_v0, %s69_s10  ;;  %19 = vrot.lane.b32.xlu1 %v57_v1, %s70_s11  ;;  %v58_v3 = vld [vmem:[%s113_s0 + $0x4] sm:$0x1]   ;;  %v2_v4 = vld [vmem:[%s113_s0] sm:$0x1]   ;;  %s71_s18 = smov 48   ;;  %s72_s19 = smov 32  }
   0x3   :  { %4 = vst.msk [vmem:[#allocation0] sm:$0x1] %vm3_vm0, %v2_v4   ;;  %v59_v5 = vld [vmem:[%s113_s0 + $0x3] sm:$0x1]   ;;  %v60_v6 = vld [vmem:[%s113_s0 + $0x2] sm:$0x1]  }
   0x4   :  { %s73_s24 = smov 24   ;;  %s74_s25 = smov 16   ;;  %v61_v7 = vld [vmem:[%s113_s0 + $0x1] sm:$0x1]   ;;  %vm27_vm4 = vcmask 326912   ;;  %vm33_vm5 = vcmask 261312  }
   0x5   :  { %s75_s0 = smov 8   ;;  %vm39_vm6 = vcmask 195712   ;;  %vm45_vm7 = vcmask 130112  }
   0x6   :  { %13 = vrot.lane.b32.xlu0 %v56_v2, %s71_s18  ;;  %25 = vrot.lane.b32.xlu1 %v58_v3, %s72_s19 }
   0xa   :  { %31 = vrot.lane.b32.xlu0 %v59_v5, %s73_s24  ;;  %37 = vrot.lane.b32.xlu1 %v60_v6, %s74_s25 }
   0xe   :  { %43 = vrot.lane.b32.xlu0 %v61_v7, %s75_s0 }
  0x74   :  { %v8_v8 = vpop.permute.xlu0 %7   ;;  %v20_v9 = vpop.permute.xlu1 %19  }
  0x75   :  { %10 = vst.msk [vmem:[#allocation0] sm:$0x1] %vm9_vm1, %v8_v8  }
  0x78   :  { %v14_v10 = vpop.permute.xlu0 %13   ;;  %v26_v11 = vpop.permute.xlu1 %25  }
  0x79   :  { %16 = vst.msk [vmem:[#allocation0] sm:$0x1] %vm15_vm2, %v14_v10  }
  0x7a   :  { %22 = vst.msk [vmem:[#allocation0] sm:$0x1] %vm21_vm3, %v20_v9  }
  0x7b   :  { %28 = vst.msk [vmem:[#allocation0] sm:$0x1] %vm27_vm4, %v26_v11  }
  0x7c   :  { %v32_v12 = vpop.permute.xlu0 %31   ;;  %v38_v13 = vpop.permute.xlu1 %37  }
  0x7d   :  { %34 = vst.msk [vmem:[#allocation0] sm:$0x1] %vm33_vm5, %v32_v12  }
  0x7e   :  { %40 = vst.msk [vmem:[#allocation0] sm:$0x1] %vm39_vm6, %v38_v13  }
  0x80   :  { %v44_v14 = vpop.permute.xlu0 %43  }
  0x81   :  { %46 = vst.msk [vmem:[#allocation0] sm:$0x1] %vm45_vm7, %v44_v14  }
  0x88   :  { %v51_v15 = vld [vmem:[#allocation0] sm:$0x1] }
  0x89   :  { %54 = vst [vmem:[%s114_s1] sm:$0x1] %v51_v15 }

// kernel: vq_decoder3d_forward.5
= control target key start
LH: loop header
LB: loop body
LE: loop exit
PB: predicated region body
PF: predicated region fallthrough
CT: control target
= control target key end

     0   :  { %v496_v14 = vmov 0   ;;  %s596_s1 = inlined_call_operand.vmem [shape: bf16[256,128], index: 1, kind: input, shape index: {}]   ;;  %s597_s0 = inlined_call_operand.vmem [shape: bf16[64,256], index: 0, kind: input, shape index: {}]   ;;  %s598_s2 = inlined_call_operand.vmem [shape: bf16[64,128], index: 2, kind: output, shape index: {}]  }
   0x1   :  { %v480_v0 = vld [vmem:[%s596_s1 + $0x78] sm:$0xff]   ;;  %v482_v2 = vld [vmem:[%s596_s1 + $0x70] sm:$0xff]   ;;  %v484_v4 = vld [vmem:[%s596_s1 + $0x68] sm:$0xff]  }
   0x2   :  { %v481_v1 = vld [vmem:[%s596_s1 + $0x38] sm:$0xff]   ;;  %423 = vmatprep.subr.bf16.mxu0 %v480_v0  ;;  %463 = vmatprep.subr.bf16.mxu1 %v480_v0  ;;  %v483_v3 = vld [vmem:[%s596_s1 + $0x30] sm:$0xff]   ;;  %v485_v5 = vld [vmem:[%s596_s1 + $0x28] sm:$0xff]  }
   0x3   :  { %424 = vmatpush3.bf16.msra.mxu0 %v481_v1  ;;  %471 = vmatpush3.bf16.msra.mxu1 %v481_v1  ;;  %v486_v6 = vld [vmem:[%s596_s1 + $0x60] sm:$0xff]   ;;  %v488_v8 = vld [vmem:[%s596_s1 + $0x58] sm:$0xff]   ;;  %v490_v10 = vld [vmem:[%s596_s1 + $0x50] sm:$0xff]  }
   0x4   :  { %425 = vmatprep.subr.bf16.mxu0 %v482_v2  ;;  %464 = vmatprep.subr.bf16.mxu1 %v482_v2  ;;  %v487_v7 = vld [vmem:[%s596_s1 + $0x20] sm:$0xff]   ;;  %v489_v9 = vld [vmem:[%s596_s1 + $0x18] sm:$0xff]   ;;  %v25_v12 = vld [vmem:[%s597_s0 + $0x8] sm:$0xff] }
   0x5   :  { %v24_v11 = vld [vmem:[%s597_s0] sm:$0xff]  ;;  %v33_v16 = vmax.bf16 %v496_v14, %v25_v12  ;;  %v29_v17 = vld [vmem:[%s597_s0 + $0x28] sm:$0xff]  ;;  %v491_v20 = vld [vmem:[%s596_s1 + $0x10] sm:$0xff]  }
   0x6   :  { %v28_v13 = vld [vmem:[%s597_s0 + $0x20] sm:$0xff]  ;;  %v32_v15 = vmax.bf16 %v496_v14, %v24_v11  ;;  %v37_v19 = vmax.bf16 %v496_v14, %v29_v17  ;;  %v492_v22 = vld [vmem:[%s596_s1 + $0x48] sm:$0xff]   ;;  %v26_v26 = vld [vmem:[%s597_s0 + $0x10] sm:$0xff] }
   0x7   :  { %426 = vmatpush3.bf16.msra.mxu0 %v483_v3  ;;  %472 = vmatpush3.bf16.msra.mxu1 %v483_v3  ;;  %v36_v18 = vmax.bf16 %v496_v14, %v28_v13  ;;  %v493_v24 = vld [vmem:[%s596_s1 + $0x8] sm:$0xff]   ;;  %v494_v25 = vld [vmem:[%s596_s1 + $0x40] sm:$0xff]   ;;  %v27_v27 = vld [vmem:[%s597_s0 + $0x18] sm:$0xff]  ;;  %v34_v30 = vmax.bf16 %v496_v14, %v26_v26 }
   0x8   :  { %427 = vmatprep.subr.bf16.mxu0 %v484_v4  ;;  %465 = vmatprep.subr.bf16.mxu1 %v484_v4  ;;  %v361_v21 = vcombine.high %v32_v15, %v33_v16  ;;  %v30_v28 = vld [vmem:[%s597_s0 + $0x30] sm:$0xff]  ;;  %v31_v29 = vld [vmem:[%s597_s0 + $0x38] sm:$0xff]  ;;  %v495_v31 = vld [vmem:[%s596_s1] sm:$0xff]   ;;  %v35_v32 = vmax.bf16 %v496_v14, %v27_v27  ;;  %v360_v35 = vcombine.low %v32_v15, %v33_v16 }
   0x9   :  { %v365_v23 = vcombine.high %v36_v18, %v37_v19  ;;  %v38_v33 = vmax.bf16 %v496_v14, %v30_v28  ;;  %v39_v34 = vmax.bf16 %v496_v14, %v31_v29  ;;  %v364_v36 = vcombine.low %v36_v18, %v37_v19 }
   0xa   :  { %248 = vmatprep.mubr.bf16.mxu0 %v361_v21  ;;  %v363_v37 = vcombine.high %v34_v30, %v35_v32  ;;  %v362_v39 = vcombine.low %v34_v30, %v35_v32 }
   0xb   :  { %428 = vmatpush3.bf16.msra.mxu0 %v485_v5  ;;  %473 = vmatpush3.bf16.msra.mxu1 %v485_v5  ;;  %v367_v38 = vcombine.high %v38_v33, %v39_v34  ;;  %v366_v40 = vcombine.low %v38_v33, %v39_v34 }
   0xc   :  { %429 = vmatprep.subr.bf16.mxu0 %v486_v6  ;;  %466 = vmatprep.subr.bf16.mxu1 %v486_v6 }
   0xd   :  { %264 = vmatprep.mubr.bf16.mxu1 %v365_v23 }
   0xf   :  { %430 = vmatpush3.bf16.msra.mxu0 %v487_v7  ;;  %474 = vmatpush3.bf16.msra.mxu1 %v487_v7 }
  0x10   :  { %431 = vmatprep.subr.bf16.mxu0 %v488_v8  ;;  %467 = vmatprep.subr.bf16.mxu1 %v488_v8 }
  0x13   :  { %432 = vmatpush3.bf16.msra.mxu0 %v489_v9  ;;  %475 = vmatpush3.bf16.msra.mxu1 %v489_v9 }
  0x14   :  { %433 = vmatprep.subr.bf16.mxu0 %v490_v10  ;;  %468 = vmatprep.subr.bf16.mxu1 %v490_v10 }
  0x17   :  { %434 = vmatpush3.bf16.msra.mxu0 %v491_v20  ;;  %476 = vmatpush3.bf16.msra.mxu1 %v491_v20 }
  0x18   :  { %435 = vmatprep.subr.bf16.mxu0 %v492_v22  ;;  %469 = vmatprep.subr.bf16.mxu1 %v492_v22 }
  0x1b   :  { %436 = vmatpush3.bf16.msra.mxu0 %v493_v24  ;;  %477 = vmatpush3.bf16.msra.mxu1 %v493_v24 }
  0x1c   :  { %437 = vmatprep.subr.bf16.mxu0 %v494_v25  ;;  %470 = vmatprep.subr.bf16.mxu1 %v494_v25 }
  0x1f   :  { %438 = vmatpush3.bf16.msra.mxu0 %v495_v31  ;;  %478 = vmatpush3.bf16.msra.mxu1 %v495_v31 }
  0x22   :  { %249 = vmatmul.mubr.bf16.vlgmr.msra.gmra.mxu0 %v360_v35  ;;  %265 = vmatmul.mubr.bf16.vlgmr.msra.gmra.mxu1 %v364_v36 }
  0x23   :  { %256 = vmatprep.mubr.bf16.mxu0 %v363_v37  ;;  %272 = vmatprep.mubr.bf16.mxu1 %v367_v38 }
  0x2a   :  { %257 = vmatmul.mubr.bf16.gmra.mxu0 %v362_v39  ;;  %273 = vmatmul.mubr.bf16.gmra.mxu1 %v366_v40 }
  0xe2   :  { %v439_v41 = vpop.f32.mrf.mxu0  ;;  %v451_v42 = vpop.f32.mrf.mxu1 }
  0xe4   :  { %v440_v43 = vpop.f32.mrf.mxu0  ;;  %v452_v44 = vpop.f32.mrf.mxu1 }
  0xe5   :  { %v441_v47 = vadd.f32 %v440_v43, %v439_v41  ;;  %v453_v48 = vadd.f32 %v452_v44, %v451_v42 }
  0xe6   :  { %v442_v45 = vpop.f32.mrf.mxu0  ;;  %v454_v46 = vpop.f32.mrf.mxu1 }
  0xe7   :  { %v308_v55 = vmax.f32 %v441_v47, 0.0  ;;  %v312_v56 = vmax.f32 %v453_v48, 0.0 }
  0xe8   :  { %v443_v49 = vpop.f32.mrf.mxu0  ;;  %v455_v50 = vpop.f32.mrf.mxu1 }
  0xe9   :  { %v444_v51 = vadd.f32 %v443_v49, %v442_v45  ;;  %v456_v52 = vadd.f32 %v455_v50, %v454_v46 }
  0xea   :  { %v445_v53 = vpop.f32.mrf.mxu0  ;;  %v457_v54 = vpop.f32.mrf.mxu1 }
  0xeb   :  { %v309_v57 = vmax.f32 %v444_v51, 0.0  ;;  %v313_v58 = vmax.f32 %v456_v52, 0.0 }
  0xec   :  { %v446_v59 = vpop.f32.mrf.mxu0  ;;  %v458_v60 = vpop.f32.mrf.mxu1 }
  0xed   :  { %v403_v61 = vpack.c.bf16 %v309_v57, %v308_v55  ;;  %v413_v62 = vpack.c.bf16 %v313_v58, %v312_v56  ;;  %v447_v1 = vadd.f32 %v446_v59, %v445_v53  ;;  %v459_v2 = vadd.f32 %v458_v60, %v457_v54 }
  0xee   :  { %v448_v63 = vpop.f32.mrf.mxu0  ;;  %v460_v0 = vpop.f32.mrf.mxu1 }
  0xef   :  { %404 = vst [vmem:[%s598_s2] sm:$0xff] %v403_v61   ;;  %421 = vst [vmem:[%s598_s2 + $0x10] sm:$0xff] %v413_v62   ;;  %v310_v7 = vmax.f32 %v447_v1, 0.0  ;;  %v314_v8 = vmax.f32 %v459_v2, 0.0 }
  0xf0   :  { %v449_v3 = vpop.f32.mrf.mxu0  ;;  %v461_v4 = vpop.f32.mrf.mxu1 }
  0xf1   :  { %v450_v5 = vadd.f32 %v449_v3, %v448_v63  ;;  %v462_v6 = vadd.f32 %v461_v4, %v460_v0 }
  0xf3   :  { %v311_v9 = vmax.f32 %v450_v5, 0.0  ;;  %v315_v10 = vmax.f32 %v462_v6, 0.0 }
  0xf5   :  { %v408_v11 = vpack.c.bf16 %v311_v9, %v310_v7  ;;  %v418_v12 = vpack.c.bf16 %v315_v10, %v314_v8 }
  0xf7   :  { %420 = vst [vmem:[%s598_s2 + $0x8] sm:$0xff] %v408_v11   ;;  %422 = vst [vmem:[%s598_s2 + $0x18] sm:$0xff] %v418_v12  }

// kernel: tile.40
= control target key start
LH: loop header
LB: loop body
LE: loop exit
PB: predicated region body
PF: predicated region fallthrough
CT: control target
= control target key end

     0   :  { %s22_s0 = inlined_call_operand.vmem [shape: f32[8], index: 0, kind: input, shape index: {}]   ;;  %s23_s1 = inlined_call_operand.vmem [shape: f32[8,8], index: 1, kind: output, shape index: {}]  }
   0x1   :  { %v4_v0 = vld [vmem:[%s22_s0] ss:$0 sm:$0xff] }
   0x2   :  { %5 = vst [vmem:[%s23_s1] sm:$0xff] %v4_v0 }

// kernel: tile.48
= control target key start
LH: loop header
LB: loop body
LE: loop exit
PB: predicated region body
PF: predicated region fallthrough
CT: control target
= control target key end

     0   :  { %s22_s0 = inlined_call_operand.vmem [shape: f32[64], index: 0, kind: input, shape index: {}]   ;;  %s23_s1 = inlined_call_operand.vmem [shape: f32[2,64], index: 1, kind: output, shape index: {}]  }
   0x1   :  { %v4_v0 = vld [vmem:[%s22_s0] ss:$0 sm:$0xff] }
   0x2   :  { %5 = vst [vmem:[%s23_s1] sm:$0x3] %v4_v0 }

// kernel: vq_decoder3d_forward.6
= control target key start
LH: loop header
LB: loop body
LE: loop exit
PB: predicated region body
PF: predicated region fallthrough
CT: control target
= control target key end

     0   :  { %s439_s1 = inlined_call_operand.vmem [shape: bf16[128,128], index: 1, kind: input, shape index: {}]   ;;  %s440_s0 = inlined_call_operand.vmem [shape: bf16[64,128], index: 0, kind: input, shape index: {}]   ;;  %s441_s2 = inlined_call_operand.vmem [shape: f32[64,128], index: 2, kind: input, shape index: {}]   ;;  %s442_s3 = inlined_call_operand.vmem [shape: f32[64,128], index: 3, kind: output, shape index: {}]  }
   0x1   :  { %v323_v0 = vld [vmem:[%s439_s1 + $0x38] sm:$0xff]   ;;  %v324_v1 = vld [vmem:[%s439_s1 + $0x30] sm:$0xff]   ;;  %v325_v2 = vld [vmem:[%s439_s1 + $0x28] sm:$0xff]  }
   0x2   :  { %283 = vmatprep.subr.bf16.mxu0 %v323_v0  ;;  %307 = vmatprep.subr.bf16.mxu1 %v323_v0  ;;  %v326_v3 = vld [vmem:[%s439_s1 + $0x20] sm:$0xff]   ;;  %v332_v5 = vld [vmem:[%s440_s0 + $0x10] sm:$0xff]   ;;  %v327_v6 = vld [vmem:[%s439_s1 + $0x18] sm:$0xff]  }
   0x3   :  { %284 = vmatpush3.bf16.msra.mxu0 %v323_v0  ;;  %315 = vmatpush3.bf16.msra.mxu1 %v323_v0  ;;  %v331_v4 = vld [vmem:[%s440_s0] sm:$0xff]   ;;  %v328_v7 = vld [vmem:[%s439_s1 + $0x10] sm:$0xff]   ;;  %v329_v8 = vld [vmem:[%s439_s1 + $0x8] sm:$0xff]  }
   0x4   :  { %285 = vmatprep.subr.bf16.mxu0 %v324_v1  ;;  %308 = vmatprep.subr.bf16.mxu1 %v324_v1  ;;  %v330_v9 = vld [vmem:[%s439_s1] sm:$0xff]   ;;  %v333_v10 = vld [vmem:[%s440_s0 + $0x8] sm:$0xff]   ;;  %v334_v11 = vld [vmem:[%s440_s0 + $0x18] sm:$0xff]  }
   0x5   :  { %299 = vmatprep.mubr.bf16.mxu0 %v331_v4  ;;  %303 = vmatprep.mubr.bf16.mxu1 %v332_v5  ;;  %v225_v12 = vld [vmem:[%s441_s2 + $0x10] sm:$0xff]  ;;  %v223_v16 = vld [vmem:[%s441_s2] sm:$0xff]  ;;  %v226_v22 = vld [vmem:[%s441_s2 + $0x18] sm:$0xff] }
   0x6   :  { %v229_v13 = vld [vmem:[%s441_s2 + $0x30] sm:$0xff]  ;;  %v227_v17 = vld [vmem:[%s441_s2 + $0x20] sm:$0xff]  ;;  %v230_v23 = vld [vmem:[%s441_s2 + $0x38] sm:$0xff] }
   0x7   :  { %286 = vmatpush3.bf16.msra.mxu0 %v324_v1  ;;  %316 = vmatpush3.bf16.msra.mxu1 %v324_v1  ;;  %v224_v30 = vld [vmem:[%s441_s2 + $0x8] sm:$0xff] }
   0x8   :  { %287 = vmatprep.subr.bf16.mxu0 %v325_v2  ;;  %309 = vmatprep.subr.bf16.mxu1 %v325_v2  ;;  %v228_v31 = vld [vmem:[%s441_s2 + $0x28] sm:$0xff] }
   0xb   :  { %288 = vmatpush3.bf16.msra.mxu0 %v325_v2  ;;  %317 = vmatpush3.bf16.msra.mxu1 %v325_v2 }
   0xc   :  { %289 = vmatprep.subr.bf16.mxu0 %v326_v3  ;;  %310 = vmatprep.subr.bf16.mxu1 %v326_v3 }
   0xf   :  { %290 = vmatpush3.bf16.msra.mxu0 %v326_v3  ;;  %318 = vmatpush3.bf16.msra.mxu1 %v326_v3 }
  0x10   :  { %291 = vmatprep.subr.bf16.mxu0 %v327_v6  ;;  %311 = vmatprep.subr.bf16.mxu1 %v327_v6 }
  0x13   :  { %292 = vmatpush3.bf16.msra.mxu0 %v327_v6  ;;  %319 = vmatpush3.bf16.msra.mxu1 %v327_v6 }
  0x14   :  { %293 = vmatprep.subr.bf16.mxu0 %v328_v7  ;;  %312 = vmatprep.subr.bf16.mxu1 %v328_v7 }
  0x17   :  { %294 = vmatpush3.bf16.msra.mxu0 %v328_v7  ;;  %320 = vmatpush3.bf16.msra.mxu1 %v328_v7 }
  0x18   :  { %295 = vmatprep.subr.bf16.mxu0 %v329_v8  ;;  %313 = vmatprep.subr.bf16.mxu1 %v329_v8 }
  0x1b   :  { %296 = vmatpush3.bf16.msra.mxu0 %v329_v8  ;;  %321 = vmatpush3.bf16.msra.mxu1 %v329_v8 }
  0x1c   :  { %297 = vmatprep.subr.bf16.mxu0 %v330_v9  ;;  %314 = vmatprep.subr.bf16.mxu1 %v330_v9 }
  0x1f   :  { %298 = vmatpush3.bf16.msra.mxu0 %v330_v9  ;;  %322 = vmatpush3.bf16.msra.mxu1 %v330_v9 }
  0x22   :  { %300 = vmatmul.mubr.bf16.vlgmr.msra.gmra.mxu0 %v333_v10  ;;  %304 = vmatmul.mubr.bf16.vlgmr.msra.gmra.mxu1 %v334_v11 }
  0xe2   :  { %v301_v14 = vpop.f32.mrf.mxu0  ;;  %v305_v15 = vpop.f32.mrf.mxu1 }
  0xe3   :  { %v233_v18 = vadd.f32 %v301_v14, %v225_v12  ;;  %v237_v19 = vadd.f32 %v305_v15, %v229_v13 }
  0xe4   :  { %v165_v20 = vpop.f32.mrf.mxu0  ;;  %v181_v21 = vpop.f32.mrf.mxu1 }
  0xe5   :  { %v241_v24 = vmax.f32 %v233_v18, 0.0  ;;  %v245_v25 = vmax.f32 %v237_v19, 0.0  ;;  %v231_v26 = vadd.f32 %v223_v16, %v165_v20  ;;  %v235_v27 = vadd.f32 %v227_v17, %v181_v21 }
  0xe6   :  { %v302_v28 = vpop.f32.mrf.mxu0  ;;  %v306_v29 = vpop.f32.mrf.mxu1 }
  0xe7   :  { %249 = vst [vmem:[%s442_s3 + $0x10] sm:$0xff] %v241_v24  ;;  %253 = vst [vmem:[%s442_s3 + $0x30] sm:$0xff] %v245_v25  ;;  %v239_v32 = vmax.f32 %v231_v26, 0.0  ;;  %v243_v33 = vmax.f32 %v235_v27, 0.0  ;;  %v234_v34 = vadd.f32 %v302_v28, %v226_v22  ;;  %v238_v35 = vadd.f32 %v306_v29, %v230_v23 }
  0xe8   :  { %v168_v36 = vpop.f32.mrf.mxu0  ;;  %v184_v37 = vpop.f32.mrf.mxu1 }
  0xe9   :  { %247 = vst [vmem:[%s442_s3] sm:$0xff] %v239_v32  ;;  %251 = vst [vmem:[%s442_s3 + $0x20] sm:$0xff] %v243_v33  ;;  %v242_v38 = vmax.f32 %v234_v34, 0.0  ;;  %v246_v39 = vmax.f32 %v238_v35, 0.0  ;;  %v232_v40 = vadd.f32 %v224_v30, %v168_v36  ;;  %v236_v41 = vadd.f32 %v228_v31, %v184_v37 }
  0xeb   :  { %250 = vst [vmem:[%s442_s3 + $0x18] sm:$0xff] %v242_v38  ;;  %254 = vst [vmem:[%s442_s3 + $0x38] sm:$0xff] %v246_v39  ;;  %v240_v42 = vmax.f32 %v232_v40, 0.0  ;;  %v244_v43 = vmax.f32 %v236_v41, 0.0 }
  0xed   :  { %248 = vst [vmem:[%s442_s3 + $0x8] sm:$0xff] %v240_v42  ;;  %252 = vst [vmem:[%s442_s3 + $0x28] sm:$0xff] %v244_v43 }

// kernel: tile.50
= control target key start
LH: loop header
LB: loop body
LE: loop exit
PB: predicated region body
PF: predicated region fallthrough
CT: control target
= control target key end

     0   :  { %vm8_vm0 = vcmask 523264   ;;  %vm14_vm1 = vcmask 1048064   ;;  %s42_s0 = inlined_call_operand.vmem [shape: f32[2,64], index: 0, kind: input, shape index: {}]   ;;  %s43_s1 = inlined_call_operand.vmem [shape: f32[1,128], index: 1, kind: output, shape index: {}]  }
   0x1   :  { %v5_v0 = vld [vmem:[%s42_s0] sm:$0x3]  ;;  %s25_s0 = smov 64  }
   0x2   :  { %6 = vst [vmem:[#allocation1] sm:$0x3] %v5_v0 }
   0x9   :  { %v11_v1 = vld [vmem:[#allocation1 + $0x1] sm:$0x1]   ;;  %v7_v2 = vld [vmem:[#allocation1] sm:$0x1]  }
   0xa   :  { %12 = vrot.lane.b32.xlu0 %v11_v1, %s25_s0  ;;  %9 = vst.msk [vmem:[#allocation0] sm:$0x1] %vm8_vm0, %v7_v2  }
  0x7c   :  { %v13_v3 = vpop.permute.xlu0 %12  }
  0x7d   :  { %15 = vst.msk [vmem:[#allocation0] sm:$0x1] %vm14_vm1, %v13_v3  }
  0x84   :  { %v20_v4 = vld [vmem:[#allocation0] sm:$0x1] }
  0x85   :  { %23 = vst [vmem:[%s43_s1] sm:$0x1] %v20_v4 }

// kernel: vq_decoder3d_forward.7
= control target key start
LH: loop header
LB: loop body
LE: loop exit
PB: predicated region body
PF: predicated region fallthrough
CT: control target
= control target key end

     0   :  { %s558_s1 = inlined_call_operand.vmem [shape: bf16[256,128], index: 1, kind: input, shape index: {}]   ;;  %s559_s0 = inlined_call_operand.vmem [shape: bf16[64,256], index: 0, kind: input, shape index: {}]   ;;  %s560_s2 = inlined_call_operand.vmem [shape: f32[1,128], index: 2, kind: input, shape index: {}]   ;;  %s561_s3 = inlined_call_operand.vmem [shape: f32[64,128], index: 3, kind: output, shape index: {}]  }
   0x1   :  { %v411_v0 = vld [vmem:[%s558_s1 + $0x78] sm:$0xff]   ;;  %v413_v2 = vld [vmem:[%s558_s1 + $0x70] sm:$0xff]   ;;  %v415_v4 = vld [vmem:[%s558_s1 + $0x68] sm:$0xff]  }
   0x2   :  { %v412_v1 = vld [vmem:[%s558_s1 + $0x38] sm:$0xff]   ;;  %355 = vmatprep.subr.bf16.mxu0 %v411_v0  ;;  %395 = vmatprep.subr.bf16.mxu1 %v411_v0  ;;  %v414_v3 = vld [vmem:[%s558_s1 + $0x30] sm:$0xff]   ;;  %v416_v5 = vld [vmem:[%s558_s1 + $0x28] sm:$0xff]  }
   0x3   :  { %356 = vmatpush3.bf16.msra.mxu0 %v412_v1  ;;  %403 = vmatpush3.bf16.msra.mxu1 %v412_v1  ;;  %v417_v6 = vld [vmem:[%s558_s1 + $0x60] sm:$0xff]   ;;  %v419_v8 = vld [vmem:[%s558_s1 + $0x58] sm:$0xff]   ;;  %v421_v10 = vld [vmem:[%s558_s1 + $0x50] sm:$0xff]  }
   0x4   :  { %357 = vmatprep.subr.bf16.mxu0 %v413_v2  ;;  %396 = vmatprep.subr.bf16.mxu1 %v413_v2  ;;  %v418_v7 = vld [vmem:[%s558_s1 + $0x20] sm:$0xff]   ;;  %v420_v9 = vld [vmem:[%s558_s1 + $0x18] sm:$0xff]   ;;  %v422_v13 = vld [vmem:[%s558_s1 + $0x10] sm:$0xff]  }
   0x5   :  { %v429_v11 = vld [vmem:[%s559_s0 + $0x4] ss:$8 sps:$4 sm:$0xff]   ;;  %v427_v18 = vld [vmem:[%s559_s0] ss:$8 sps:$4 sm:$0xff]   ;;  %v433_v20 = vld [vmem:[%s559_s0 + $0x14] ss:$8 sps:$4 sm:$0xff]  }
   0x6   :  { %v432_v12 = vld [vmem:[%s559_s0 + $0x24] ss:$8 sps:$4 sm:$0xff]   ;;  %243 = vmatprep.mubr.bf16.mxu0 %v429_v11  ;;  %v430_v19 = vld [vmem:[%s559_s0 + $0x20] ss:$8 sps:$4 sm:$0xff]   ;;  %v435_v21 = vld [vmem:[%s559_s0 + $0x34] ss:$8 sps:$4 sm:$0xff]  }
   0x7   :  { %358 = vmatpush3.bf16.msra.mxu0 %v414_v3  ;;  %404 = vmatpush3.bf16.msra.mxu1 %v414_v3  ;;  %v423_v14 = vld [vmem:[%s558_s1 + $0x48] sm:$0xff]   ;;  %v425_v16 = vld [vmem:[%s558_s1 + $0x40] sm:$0xff]   ;;  %v437_v22 = vld [vmem:[%s559_s0 + $0x10] ss:$8 sps:$4 sm:$0xff]  }
   0x8   :  { %359 = vmatprep.subr.bf16.mxu0 %v415_v4  ;;  %397 = vmatprep.subr.bf16.mxu1 %v415_v4  ;;  %v424_v15 = vld [vmem:[%s558_s1 + $0x8] sm:$0xff]   ;;  %v426_v17 = vld [vmem:[%s558_s1] sm:$0xff]   ;;  %v438_v23 = vld [vmem:[%s559_s0 + $0x30] ss:$8 sps:$4 sm:$0xff]  }
   0x9   :  { %259 = vmatprep.mubr.bf16.mxu1 %v432_v12  ;;  %v354_v27 = vld [vmem:[%s560_s2] ss:$0 sm:$0xff] }
   0xb   :  { %360 = vmatpush3.bf16.msra.mxu0 %v416_v5  ;;  %405 = vmatpush3.bf16.msra.mxu1 %v416_v5 }
   0xc   :  { %361 = vmatprep.subr.bf16.mxu0 %v417_v6  ;;  %398 = vmatprep.subr.bf16.mxu1 %v417_v6 }
   0xf   :  { %362 = vmatpush3.bf16.msra.mxu0 %v418_v7  ;;  %406 = vmatpush3.bf16.msra.mxu1 %v418_v7 }
  0x10   :  { %363 = vmatprep.subr.bf16.mxu0 %v419_v8  ;;  %399 = vmatprep.subr.bf16.mxu1 %v419_v8 }
  0x13   :  { %364 = vmatpush3.bf16.msra.mxu0 %v420_v9  ;;  %407 = vmatpush3.bf16.msra.mxu1 %v420_v9 }
  0x14   :  { %365 = vmatprep.subr.bf16.mxu0 %v421_v10  ;;  %400 = vmatprep.subr.bf16.mxu1 %v421_v10 }
  0x17   :  { %366 = vmatpush3.bf16.msra.mxu0 %v422_v13  ;;  %408 = vmatpush3.bf16.msra.mxu1 %v422_v13 }
  0x18   :  { %367 = vmatprep.subr.bf16.mxu0 %v423_v14  ;;  %401 = vmatprep.subr.bf16.mxu1 %v423_v14 }
  0x1b   :  { %368 = vmatpush3.bf16.msra.mxu0 %v424_v15  ;;  %409 = vmatpush3.bf16.msra.mxu1 %v424_v15 }
  0x1c   :  { %369 = vmatprep.subr.bf16.mxu0 %v425_v16  ;;  %402 = vmatprep.subr.bf16.mxu1 %v425_v16 }
  0x1f   :  { %370 = vmatpush3.bf16.msra.mxu0 %v426_v17  ;;  %410 = vmatpush3.bf16.msra.mxu1 %v426_v17 }
  0x22   :  { %244 = vmatmul.mubr.bf16.vlgmr.msra.gmra.mxu0 %v427_v18  ;;  %260 = vmatmul.mubr.bf16.vlgmr.msra.gmra.mxu1 %v430_v19 }
  0x23   :  { %251 = vmatprep.mubr.bf16.mxu0 %v433_v20  ;;  %267 = vmatprep.mubr.bf16.mxu1 %v435_v21 }
  0x2a   :  { %252 = vmatmul.mubr.bf16.gmra.mxu0 %v437_v22  ;;  %268 = vmatmul.mubr.bf16.gmra.mxu1 %v438_v23 }
  0xe2   :  { %v371_v24 = vpop.f32.mrf.mxu0  ;;  %v383_v25 = vpop.f32.mrf.mxu1 }
  0xe4   :  { %v372_v26 = vpop.f32.mrf.mxu0  ;;  %v384_v28 = vpop.f32.mrf.mxu1 }
  0xe5   :  { %v373_v29 = vadd.f32 %v372_v26, %v371_v24  ;;  %v385_v30 = vadd.f32 %v384_v28, %v383_v25 }
  0xe6   :  { %v374_v31 = vpop.f32.mrf.mxu0  ;;  %v386_v32 = vpop.f32.mrf.mxu1 }
  0xe7   :  { %v310_v33 = vadd.f32 %v373_v29, %v354_v27  ;;  %v314_v34 = vadd.f32 %v385_v30, %v354_v27 }
  0xe8   :  { %v375_v35 = vpop.f32.mrf.mxu0  ;;  %v387_v36 = vpop.f32.mrf.mxu1 }
  0xe9   :  { %318 = vst [vmem:[%s561_s3] sm:$0xff] %v310_v33  ;;  %322 = vst [vmem:[%s561_s3 + $0x20] sm:$0xff] %v314_v34  ;;  %v376_v37 = vadd.f32 %v375_v35, %v374_v31  ;;  %v388_v38 = vadd.f32 %v387_v36, %v386_v32 }
  0xea   :  { %v377_v39 = vpop.f32.mrf.mxu0  ;;  %v389_v40 = vpop.f32.mrf.mxu1 }
  0xeb   :  { %v311_v41 = vadd.f32 %v376_v37, %v354_v27  ;;  %v315_v42 = vadd.f32 %v388_v38, %v354_v27 }
  0xec   :  { %v378_v43 = vpop.f32.mrf.mxu0  ;;  %v390_v44 = vpop.f32.mrf.mxu1 }
  0xed   :  { %319 = vst [vmem:[%s561_s3 + $0x8] sm:$0xff] %v311_v41  ;;  %323 = vst [vmem:[%s561_s3 + $0x28] sm:$0xff] %v315_v42  ;;  %v379_v45 = vadd.f32 %v378_v43, %v377_v39  ;;  %v391_v46 = vadd.f32 %v390_v44, %v389_v40 }
  0xee   :  { %v380_v47 = vpop.f32.mrf.mxu0  ;;  %v392_v48 = vpop.f32.mrf.mxu1 }
  0xef   :  { %v312_v49 = vadd.f32 %v379_v45, %v354_v27  ;;  %v316_v50 = vadd.f32 %v391_v46, %v354_v27 }
  0xf0   :  { %v381_v51 = vpop.f32.mrf.mxu0  ;;  %v393_v52 = vpop.f32.mrf.mxu1 }
  0xf1   :  { %320 = vst [vmem:[%s561_s3 + $0x10] sm:$0xff] %v312_v49  ;;  %324 = vst [vmem:[%s561_s3 + $0x30] sm:$0xff] %v316_v50  ;;  %v382_v53 = vadd.f32 %v381_v51, %v380_v47  ;;  %v394_v54 = vadd.f32 %v393_v52, %v392_v48 }
  0xf3   :  { %v313_v55 = vadd.f32 %v382_v53, %v354_v27  ;;  %v317_v56 = vadd.f32 %v394_v54, %v354_v27 }
  0xf5   :  { %321 = vst [vmem:[%s561_s3 + $0x18] sm:$0xff] %v313_v55  ;;  %325 = vst [vmem:[%s561_s3 + $0x38] sm:$0xff] %v317_v56 }

// kernel: vq_decoder3d_forward.8
= control target key start
LH: loop header
LB: loop body
LE: loop exit
PB: predicated region body
PF: predicated region fallthrough
CT: control target
= control target key end

     0   :  { %s133_s0 = inlined_call_operand.vmem [shape: f32[32,128], index: 0, kind: input, shape index: {}]   ;;  %s134_s1 = inlined_call_operand.vmem [shape: f32[1,128], index: 1, kind: input, shape index: {}]   ;;  %s135_s2 = inlined_call_operand.vmem [shape: f32[1,128], index: 2, kind: input, shape index: {}]   ;;  %s136_s3 = inlined_call_operand.vmem [shape: bf16[32,128], index: 3, kind: output, shape index: {}]  }
   0x1   :  { %v14_v0 = vld [vmem:[%s133_s0] sm:$0xff]  ;;  %v15_v1 = vld [vmem:[%s133_s0 + $0x8] sm:$0xff]  ;;  %v16_v6 = vld [vmem:[%s133_s0 + $0x10] sm:$0xff] }
   0x2   :  { %v68_v2 = vld [vmem:[%s134_s1] ss:$0 sm:$0xff]  ;;  %v17_v7 = vld [vmem:[%s133_s0 + $0x18] sm:$0xff] }
   0x3   :  { %v25_v3 = vmul.f32 %v68_v2, %v14_v0  ;;  %v26_v4 = vmul.f32 %v68_v2, %v15_v1  ;;  %v69_v5 = vld [vmem:[%s135_s2] ss:$0 sm:$0xff]  ;;  %v27_v8 = vmul.f32 %v68_v2, %v16_v6  ;;  %v28_v9 = vmul.f32 %v68_v2, %v17_v7 }
   0x5   :  { %v36_v10 = vadd.f32 %v69_v5, %v25_v3  ;;  %v37_v11 = vadd.f32 %v69_v5, %v26_v4  ;;  %v38_v12 = vadd.f32 %v69_v5, %v27_v8  ;;  %v39_v13 = vadd.f32 %v69_v5, %v28_v9 }
   0x7   :  { %v40_v14 = vmax.f32 %v36_v10, 0.0  ;;  %v41_v15 = vmax.f32 %v37_v11, 0.0  ;;  %v42_v16 = vmax.f32 %v38_v12, 0.0  ;;  %v43_v17 = vmax.f32 %v39_v13, 0.0 }
   0x9   :  { %v81_v18 = vpack.c.bf16 %v41_v15, %v40_v14  ;;  %v86_v19 = vpack.c.bf16 %v43_v17, %v42_v16 }
   0xb   :  { %82 = vst [vmem:[%s136_s3] sm:$0xff] %v81_v18   ;;  %88 = vst [vmem:[%s136_s3 + $0x8] sm:$0xff] %v86_v19  }

// kernel: vq_decoder3d_forward.9
= control target key start
LH: loop header
LB: loop body
LE: loop exit
PB: predicated region body
PF: predicated region fallthrough
CT: control target
= control target key end

     0   :  { %s1425_s12 = smov 0   ;;  %s1427_s13 = smov 0   ;;  %s1618_s0 = inlined_call_operand.vmem [shape: bf16[512,256], index: 0, kind: input, shape index: {}]   ;;  %s1619_s1 = inlined_call_operand.vmem [shape: bf16[256,128], index: 1, kind: input, shape index: {}]   ;;  %s1620_s2 = inlined_call_operand.vmem [shape: f32[1,128], index: 2, kind: input, shape index: {}]   ;;  %s1621_s3 = inlined_call_operand.vmem [shape: f32[512,128], index: 3, kind: output, shape index: {}]  }
   0x1   :  { %s1429_s14 = smov 0  }
   0x2 LB: > { %s32_s15 = sadd.s32 1, %s1399_s13  ;;  %p1107_p0 = scmp.ge.s32.totalorder %s1403_s14, 1  ;;  %s1403_s14 = sphi %s1429_s14, %s13_s14   ;;  %s1399_s13 = sphi %s1427_s13, %s1623_s13   ;;  %s1395_s12 = sphi %s1425_s12, %s1622_s12  }
   0x3   : > { %p34_p1 = scmp.ge.s32.totalorder %s32_s15, 2  ;;  %p191_p2 = scmp.lt.s32.totalorder %s1403_s14, 3 }
   0x5   : > { %s1625_s15 = smov (%p34_p1, %s32_s15), 0  ;;  %p192_p3 = pnand %p1107_p0, %p191_p2 }
   0x6   : > { %s1108_s18 = sshll.u32 (!%p192_p3), %s1395_s12, 5 }
   0x7   : > { %195 = sbr.rel (%p192_p3) target bundleno = 305 (0x131), region = 32  ;;  %p236_p4 = scmp.lt.s32.totalorder (!%p192_p3), %s1108_s18, 63 }
   0xc   : > { %v1317_v0 = vld [vmem:[%s1619_s1 + $0x78] sm:$0xff]   ;;  %v1319_v2 = vld [vmem:[%s1619_s1 + $0x70] sm:$0xff]   ;;  %v1321_v4 = vld [vmem:[%s1619_s1 + $0x68] sm:$0xff]   ;;  %s1627_s18 = smov (!%p236_p4, %s1108_s18), 63 }
   0xd   : > { %v1318_v1 = vld [vmem:[%s1619_s1 + $0x38] sm:$0xff]   ;;  %1165 = vmatprep.subr.bf16.mxu0 %v1317_v0  ;;  %1277 = vmatprep.subr.bf16.mxu1 %v1317_v0  ;;  %v1320_v3 = vld [vmem:[%s1619_s1 + $0x30] sm:$0xff]   ;;  %v1322_v5 = vld [vmem:[%s1619_s1 + $0x28] sm:$0xff]   ;;  %s1164_s6 = sshll.u32 %s1627_s18, 3 }
   0xe   : > { %1166 = vmatpush3.bf16.msra.mxu0 %v1318_v1  ;;  %1285 = vmatpush3.bf16.msra.mxu1 %v1318_v1  ;;  %v1323_v6 = vld [vmem:[%s1619_s1 + $0x60] sm:$0xff]   ;;  %v1325_v8 = vld [vmem:[%s1619_s1 + $0x58] sm:$0xff]   ;;  %s1478_s11 = scalar_lea.vmem %s1618_s0, %s1164_s6  ;;  %v1327_v10 = vld [vmem:[%s1619_s1 + $0x50] sm:$0xff]   ;;  %s1543_s8 = scalar_lea.vmem %s1621_s3, %s1164_s6 }
   0xf   : > { %1167 = vmatprep.subr.bf16.mxu0 %v1319_v2  ;;  %1278 = vmatprep.subr.bf16.mxu1 %v1319_v2  ;;  %v1324_v7 = vld [vmem:[%s1619_s1 + $0x20] sm:$0xff]   ;;  %v1326_v9 = vld [vmem:[%s1619_s1 + $0x18] sm:$0xff]   ;;  %v1328_v13 = vld [vmem:[%s1619_s1 + $0x10] sm:$0xff]  }
  0x10   : > { %v1335_v11 = vld [vmem:[%s1478_s11 + $0x4] ss:$8 sps:$4 sm:$0xff]   ;;  %v1333_v18 = vld [vmem:[%s1478_s11] ss:$8 sps:$4 sm:$0xff]   ;;  %v1339_v20 = vld [vmem:[%s1478_s11 + $0x14] ss:$8 sps:$4 sm:$0xff]  }
  0x11   : > { %v1338_v12 = vld [vmem:[%s1478_s11 + $0x84] ss:$8 sps:$4 sm:$0xff]   ;;  %688 = vmatprep.mubr.bf16.mxu0 %v1335_v11  ;;  %v1336_v19 = vld [vmem:[%s1478_s11 + $0x80] ss:$8 sps:$4 sm:$0xff]   ;;  %v1341_v21 = vld [vmem:[%s1478_s11 + $0x94] ss:$8 sps:$4 sm:$0xff]  }
  0x12   : > { %1168 = vmatpush3.bf16.msra.mxu0 %v1320_v3  ;;  %1286 = vmatpush3.bf16.msra.mxu1 %v1320_v3  ;;  %v1329_v14 = vld [vmem:[%s1619_s1 + $0x48] sm:$0xff]   ;;  %v1331_v16 = vld [vmem:[%s1619_s1 + $0x40] sm:$0xff]   ;;  %v1343_v22 = vld [vmem:[%s1478_s11 + $0x10] ss:$8 sps:$4 sm:$0xff]  }
  0x13   : > { %1169 = vmatprep.subr.bf16.mxu0 %v1321_v4  ;;  %1279 = vmatprep.subr.bf16.mxu1 %v1321_v4  ;;  %v1330_v15 = vld [vmem:[%s1619_s1 + $0x8] sm:$0xff]   ;;  %v1332_v17 = vld [vmem:[%s1619_s1] sm:$0xff]   ;;  %v1344_v23 = vld [vmem:[%s1478_s11 + $0x90] ss:$8 sps:$4 sm:$0xff]  }
  0x14   : > { %752 = vmatprep.mubr.bf16.mxu1 %v1338_v12  ;;  %v1345_v24 = vld [vmem:[%s1478_s11 + $0x24] ss:$8 sps:$4 sm:$0xff]   ;;  %v1349_v26 = vld [vmem:[%s1478_s11 + $0x20] ss:$8 sps:$4 sm:$0xff]   ;;  %v1351_v28 = vld [vmem:[%s1478_s11 + $0x34] ss:$8 sps:$4 sm:$0xff]  }
  0x15   : > { %v1347_v25 = vld [vmem:[%s1478_s11 + $0xa4] ss:$8 sps:$4 sm:$0xff]   ;;  %v1350_v27 = vld [vmem:[%s1478_s11 + $0xa0] ss:$8 sps:$4 sm:$0xff]   ;;  %v1353_v29 = vld [vmem:[%s1478_s11 + $0xb4] ss:$8 sps:$4 sm:$0xff]  }
  0x16   : > { %1170 = vmatpush3.bf16.msra.mxu0 %v1322_v5  ;;  %1287 = vmatpush3.bf16.msra.mxu1 %v1322_v5  ;;  %v1355_v30 = vld [vmem:[%s1478_s11 + $0x30] ss:$8 sps:$4 sm:$0xff]   ;;  %v1357_v32 = vld [vmem:[%s1478_s11 + $0x44] ss:$8 sps:$4 sm:$0xff]   ;;  %v1361_v34 = vld [vmem:[%s1478_s11 + $0x40] ss:$8 sps:$4 sm:$0xff]  }
  0x17   : > { %1171 = vmatprep.subr.bf16.mxu0 %v1323_v6  ;;  %1280 = vmatprep.subr.bf16.mxu1 %v1323_v6  ;;  %v1356_v31 = vld [vmem:[%s1478_s11 + $0xb0] ss:$8 sps:$4 sm:$0xff]   ;;  %v1359_v33 = vld [vmem:[%s1478_s11 + $0xc4] ss:$8 sps:$4 sm:$0xff]   ;;  %v1362_v35 = vld [vmem:[%s1478_s11 + $0xc0] ss:$8 sps:$4 sm:$0xff]  }
  0x18   : > { %v1363_v36 = vld [vmem:[%s1478_s11 + $0x54] ss:$8 sps:$4 sm:$0xff]   ;;  %v1367_v38 = vld [vmem:[%s1478_s11 + $0x50] ss:$8 sps:$4 sm:$0xff]   ;;  %v1369_v40 = vld [vmem:[%s1478_s11 + $0x64] ss:$8 sps:$4 sm:$0xff]  }
  0x19   : > { %v1365_v37 = vld [vmem:[%s1478_s11 + $0xd4] ss:$8 sps:$4 sm:$0xff]   ;;  %v1368_v39 = vld [vmem:[%s1478_s11 + $0xd0] ss:$8 sps:$4 sm:$0xff]   ;;  %v1371_v41 = vld [vmem:[%s1478_s11 + $0xe4] ss:$8 sps:$4 sm:$0xff]  }
  0x1a   : > { %1172 = vmatpush3.bf16.msra.mxu0 %v1324_v7  ;;  %1288 = vmatpush3.bf16.msra.mxu1 %v1324_v7  ;;  %v1373_v42 = vld [vmem:[%s1478_s11 + $0x60] ss:$8 sps:$4 sm:$0xff]   ;;  %v1375_v44 = vld [vmem:[%s1478_s11 + $0x74] ss:$8 sps:$4 sm:$0xff]   ;;  %v1379_v46 = vld [vmem:[%s1478_s11 + $0x70] ss:$8 sps:$4 sm:$0xff]  }
  0x1b   : > { %1173 = vmatprep.subr.bf16.mxu0 %v1325_v8  ;;  %1281 = vmatprep.subr.bf16.mxu1 %v1325_v8  ;;  %v1374_v43 = vld [vmem:[%s1478_s11 + $0xe0] ss:$8 sps:$4 sm:$0xff]   ;;  %v1377_v45 = vld [vmem:[%s1478_s11 + $0xf4] ss:$8 sps:$4 sm:$0xff]   ;;  %v1380_v47 = vld [vmem:[%s1478_s11 + $0xf0] ss:$8 sps:$4 sm:$0xff]  }
  0x1c   : > { %v1536_v51 = vld [vmem:[%s1620_s2] ss:$0 sm:$0xff] }
  0x1e   : > { %1174 = vmatpush3.bf16.msra.mxu0 %v1326_v9  ;;  %1289 = vmatpush3.bf16.msra.mxu1 %v1326_v9 }
  0x1f   : > { %1175 = vmatprep.subr.bf16.mxu0 %v1327_v10  ;;  %1282 = vmatprep.subr.bf16.mxu1 %v1327_v10 }
  0x22   : > { %1176 = vmatpush3.bf16.msra.mxu0 %v1328_v13  ;;  %1290 = vmatpush3.bf16.msra.mxu1 %v1328_v13 }
  0x23   : > { %1177 = vmatprep.subr.bf16.mxu0 %v1329_v14  ;;  %1283 = vmatprep.subr.bf16.mxu1 %v1329_v14 }
  0x26   : > { %1178 = vmatpush3.bf16.msra.mxu0 %v1330_v15  ;;  %1291 = vmatpush3.bf16.msra.mxu1 %v1330_v15 }
  0x27   : > { %1179 = vmatprep.subr.bf16.mxu0 %v1331_v16  ;;  %1284 = vmatprep.subr.bf16.mxu1 %v1331_v16 }
  0x2a   : > { %1180 = vmatpush3.bf16.msra.mxu0 %v1332_v17  ;;  %1292 = vmatpush3.bf16.msra.mxu1 %v1332_v17 }
  0x2d   : > { %689 = vmatmul.mubr.bf16.vlgmr.msra.gmra.mxu0 %v1333_v18  ;;  %753 = vmatmul.mubr.bf16.vlgmr.msra.gmra.mxu1 %v1336_v19 }
  0x2e   : > { %696 = vmatprep.mubr.bf16.mxu0 %v1339_v20  ;;  %760 = vmatprep.mubr.bf16.mxu1 %v1341_v21 }
  0x35   : > { %697 = vmatmul.mubr.bf16.gmra.mxu0 %v1343_v22  ;;  %761 = vmatmul.mubr.bf16.gmra.mxu1 %v1344_v23 }
  0x36   : > { %704 = vmatprep.mubr.bf16.mxu0 %v1345_v24  ;;  %768 = vmatprep.mubr.bf16.mxu1 %v1347_v25 }
  0x3d   : > { %705 = vmatmul.mubr.bf16.gmra.mxu0 %v1349_v26  ;;  %769 = vmatmul.mubr.bf16.gmra.mxu1 %v1350_v27 }
  0x3e   : > { %712 = vmatprep.mubr.bf16.mxu0 %v1351_v28  ;;  %776 = vmatprep.mubr.bf16.mxu1 %v1353_v29 }
  0x45   : > { %713 = vmatmul.mubr.bf16.gmra.mxu0 %v1355_v30  ;;  %777 = vmatmul.mubr.bf16.gmra.mxu1 %v1356_v31 }
  0x46   : > { %720 = vmatprep.mubr.bf16.mxu0 %v1357_v32  ;;  %784 = vmatprep.mubr.bf16.mxu1 %v1359_v33 }
  0x4d   : > { %721 = vmatmul.mubr.bf16.gmra.mxu0 %v1361_v34  ;;  %785 = vmatmul.mubr.bf16.gmra.mxu1 %v1362_v35 }
  0x4e   : > { %728 = vmatprep.mubr.bf16.mxu0 %v1363_v36  ;;  %792 = vmatprep.mubr.bf16.mxu1 %v1365_v37 }
  0x55   : > { %729 = vmatmul.mubr.bf16.gmra.mxu0 %v1367_v38  ;;  %793 = vmatmul.mubr.bf16.gmra.mxu1 %v1368_v39 }
  0x56   : > { %736 = vmatprep.mubr.bf16.mxu0 %v1369_v40  ;;  %800 = vmatprep.mubr.bf16.mxu1 %v1371_v41 }
  0x5d   : > { %737 = vmatmul.mubr.bf16.gmra.mxu0 %v1373_v42  ;;  %801 = vmatmul.mubr.bf16.gmra.mxu1 %v1374_v43 }
  0x5e   : > { %744 = vmatprep.mubr.bf16.mxu0 %v1375_v44  ;;  %808 = vmatprep.mubr.bf16.mxu1 %v1377_v45 }
  0x65   : > { %745 = vmatmul.mubr.bf16.gmra.mxu0 %v1379_v46  ;;  %809 = vmatmul.mubr.bf16.gmra.mxu1 %v1380_v47 }
  0xed   : > { %v1181_v48 = vpop.f32.mrf.mxu0  ;;  %v1229_v49 = vpop.f32.mrf.mxu1 }
  0xef   : > { %v1182_v50 = vpop.f32.mrf.mxu0  ;;  %v1230_v52 = vpop.f32.mrf.mxu1 }
  0xf0   : > { %v1183_v53 = vadd.f32 %v1182_v50, %v1181_v48  ;;  %v1231_v54 = vadd.f32 %v1230_v52, %v1229_v49 }
  0xf1   : > { %v1184_v55 = vpop.f32.mrf.mxu0  ;;  %v1232_v56 = vpop.f32.mrf.mxu1 }
  0xf2   : > { %v923_v57 = vadd.f32 %v1183_v53, %v1536_v51  ;;  %v939_v58 = vadd.f32 %v1231_v54, %v1536_v51 }
  0xf3   : > { %v1185_v59 = vpop.f32.mrf.mxu0  ;;  %v1233_v60 = vpop.f32.mrf.mxu1 }
  0xf4   : > { %955 = vst [vmem:[%s1543_s8] sm:$0xff] %v923_v57  ;;  %971 = vst [vmem:[%s1543_s8 + $0x80] sm:$0xff] %v939_v58  ;;  %v1186_v61 = vadd.f32 %v1185_v59, %v1184_v55  ;;  %v1234_v62 = vadd.f32 %v1233_v60, %v1232_v56 }
  0xf5   : > { %v1187_v63 = vpop.f32.mrf.mxu0  ;;  %v1235_v0 = vpop.f32.mrf.mxu1 }
  0xf6   : > { %v924_v1 = vadd.f32 %v1186_v61, %v1536_v51  ;;  %v940_v2 = vadd.f32 %v1234_v62, %v1536_v51 }
  0xf7   : > { %v1188_v3 = vpop.f32.mrf.mxu0  ;;  %v1236_v4 = vpop.f32.mrf.mxu1 }
  0xf8   : > { %956 = vst [vmem:[%s1543_s8 + $0x8] sm:$0xff] %v924_v1  ;;  %972 = vst [vmem:[%s1543_s8 + $0x88] sm:$0xff] %v940_v2  ;;  %v1189_v5 = vadd.f32 %v1188_v3, %v1187_v63  ;;  %v1237_v6 = vadd.f32 %v1236_v4, %v1235_v0 }
  0xf9   : > { %v1190_v7 = vpop.f32.mrf.mxu0  ;;  %v1238_v8 = vpop.f32.mrf.mxu1 }
  0xfa   : > { %v925_v9 = vadd.f32 %v1189_v5, %v1536_v51  ;;  %v941_v10 = vadd.f32 %v1237_v6, %v1536_v51 }
  0xfb   : > { %v1191_v11 = vpop.f32.mrf.mxu0  ;;  %v1239_v12 = vpop.f32.mrf.mxu1 }
  0xfc   : > { %957 = vst [vmem:[%s1543_s8 + $0x10] sm:$0xff] %v925_v9  ;;  %973 = vst [vmem:[%s1543_s8 + $0x90] sm:$0xff] %v941_v10  ;;  %v1192_v13 = vadd.f32 %v1191_v11, %v1190_v7  ;;  %v1240_v14 = vadd.f32 %v1239_v12, %v1238_v8 }
  0xfd   : > { %v1193_v15 = vpop.f32.mrf.mxu0  ;;  %v1241_v16 = vpop.f32.mrf.mxu1 }
  0xfe   : > { %v926_v17 = vadd.f32 %v1192_v13, %v1536_v51  ;;  %v942_v18 = vadd.f32 %v1240_v14, %v1536_v51 }
  0xff   : > { %v1194_v19 = vpop.f32.mrf.mxu0  ;;  %v1242_v20 = vpop.f32.mrf.mxu1 }
 0x100   : > { %958 = vst [vmem:[%s1543_s8 + $0x18] sm:$0xff] %v926_v17  ;;  %974 = vst [vmem:[%s1543_s8 + $0x98] sm:$0xff] %v942_v18  ;;  %v1195_v21 = vadd.f32 %v1194_v19, %v1193_v15  ;;  %v1243_v22 = vadd.f32 %v1242_v20, %v1241_v16 }
 0x101   : > { %v1196_v23 = vpop.f32.mrf.mxu0  ;;  %v1244_v24 = vpop.f32.mrf.mxu1 }
 0x102   : > { %v927_v25 = vadd.f32 %v1195_v21, %v1536_v51  ;;  %v943_v26 = vadd.f32 %v1243_v22, %v1536_v51 }
 0x103   : > { %v1197_v27 = vpop.f32.mrf.mxu0  ;;  %v1245_v28 = vpop.f32.mrf.mxu1 }
 0x104   : > { %959 = vst [vmem:[%s1543_s8 + $0x20] sm:$0xff] %v927_v25  ;;  %975 = vst [vmem:[%s1543_s8 + $0xa0] sm:$0xff] %v943_v26  ;;  %v1198_v29 = vadd.f32 %v1197_v27, %v1196_v23  ;;  %v1246_v30 = vadd.f32 %v1245_v28, %v1244_v24 }
 0x105   : > { %v1199_v31 = vpop.f32.mrf.mxu0  ;;  %v1247_v32 = vpop.f32.mrf.mxu1 }
 0x106   : > { %v928_v33 = vadd.f32 %v1198_v29, %v1536_v51  ;;  %v944_v34 = vadd.f32 %v1246_v30, %v1536_v51 }
 0x107   : > { %v1200_v35 = vpop.f32.mrf.mxu0  ;;  %v1248_v36 = vpop.f32.mrf.mxu1 }
 0x108   : > { %960 = vst [vmem:[%s1543_s8 + $0x28] sm:$0xff] %v928_v33  ;;  %976 = vst [vmem:[%s1543_s8 + $0xa8] sm:$0xff] %v944_v34  ;;  %v1201_v37 = vadd.f32 %v1200_v35, %v1199_v31  ;;  %v1249_v38 = vadd.f32 %v1248_v36, %v1247_v32 }
 0x109   : > { %v1202_v39 = vpop.f32.mrf.mxu0  ;;  %v1250_v40 = vpop.f32.mrf.mxu1 }
 0x10a   : > { %v929_v41 = vadd.f32 %v1201_v37, %v1536_v51  ;;  %v945_v42 = vadd.f32 %v1249_v38, %v1536_v51 }
 0x10b   : > { %v1203_v43 = vpop.f32.mrf.mxu0  ;;  %v1251_v44 = vpop.f32.mrf.mxu1 }
 0x10c   : > { %961 = vst [vmem:[%s1543_s8 + $0x30] sm:$0xff] %v929_v41  ;;  %977 = vst [vmem:[%s1543_s8 + $0xb0] sm:$0xff] %v945_v42  ;;  %v1204_v45 = vadd.f32 %v1203_v43, %v1202_v39  ;;  %v1252_v46 = vadd.f32 %v1251_v44, %v1250_v40 }
 0x10d   : > { %v1205_v47 = vpop.f32.mrf.mxu0  ;;  %v1253_v48 = vpop.f32.mrf.mxu1 }
 0x10e   : > { %v930_v49 = vadd.f32 %v1204_v45, %v1536_v51  ;;  %v946_v50 = vadd.f32 %v1252_v46, %v1536_v51 }
 0x10f   : > { %v1206_v52 = vpop.f32.mrf.mxu0  ;;  %v1254_v53 = vpop.f32.mrf.mxu1 }
 0x110   : > { %962 = vst [vmem:[%s1543_s8 + $0x38] sm:$0xff] %v930_v49  ;;  %978 = vst [vmem:[%s1543_s8 + $0xb8] sm:$0xff] %v946_v50  ;;  %v1207_v54 = vadd.f32 %v1206_v52, %v1205_v47  ;;  %v1255_v55 = vadd.f32 %v1254_v53, %v1253_v48 }
 0x111   : > { %v1208_v56 = vpop.f32.mrf.mxu0  ;;  %v1256_v57 = vpop.f32.mrf.mxu1 }
 0x112   : > { %v931_v58 = vadd.f32 %v1207_v54, %v1536_v51  ;;  %v947_v59 = vadd.f32 %v1255_v55, %v1536_v51 }
 0x113   : > { %v1209_v60 = vpop.f32.mrf.mxu0  ;;  %v1257_v61 = vpop.f32.mrf.mxu1 }
 0x114   : > { %963 = vst [vmem:[%s1543_s8 + $0x40] sm:$0xff] %v931_v58  ;;  %979 = vst [vmem:[%s1543_s8 + $0xc0] sm:$0xff] %v947_v59  ;;  %v1210_v62 = vadd.f32 %v1209_v60, %v1208_v56  ;;  %v1258_v63 = vadd.f32 %v1257_v61, %v1256_v57 }
 0x115   : > { %v1211_v0 = vpop.f32.mrf.mxu0  ;;  %v1259_v1 = vpop.f32.mrf.mxu1 }
 0x116   : > { %v932_v2 = vadd.f32 %v1210_v62, %v1536_v51  ;;  %v948_v3 = vadd.f32 %v1258_v63, %v1536_v51 }
 0x117   : > { %v1212_v4 = vpop.f32.mrf.mxu0  ;;  %v1260_v5 = vpop.f32.mrf.mxu1 }
 0x118   : > { %964 = vst [vmem:[%s1543_s8 + $0x48] sm:$0xff] %v932_v2  ;;  %980 = vst [vmem:[%s1543_s8 + $0xc8] sm:$0xff] %v948_v3  ;;  %v1213_v6 = vadd.f32 %v1212_v4, %v1211_v0  ;;  %v1261_v7 = vadd.f32 %v1260_v5, %v1259_v1 }
 0x119   : > { %v1214_v8 = vpop.f32.mrf.mxu0  ;;  %v1262_v9 = vpop.f32.mrf.mxu1 }
 0x11a   : > { %v933_v10 = vadd.f32 %v1213_v6, %v1536_v51  ;;  %v949_v11 = vadd.f32 %v1261_v7, %v1536_v51 }
 0x11b   : > { %v1215_v12 = vpop.f32.mrf.mxu0  ;;  %v1263_v13 = vpop.f32.mrf.mxu1 }
 0x11c   : > { %965 = vst [vmem:[%s1543_s8 + $0x50] sm:$0xff] %v933_v10  ;;  %981 = vst [vmem:[%s1543_s8 + $0xd0] sm:$0xff] %v949_v11  ;;  %v1216_v14 = vadd.f32 %v1215_v12, %v1214_v8  ;;  %v1264_v15 = vadd.f32 %v1263_v13, %v1262_v9 }
 0x11d   : > { %v1217_v16 = vpop.f32.mrf.mxu0  ;;  %v1265_v17 = vpop.f32.mrf.mxu1 }
 0x11e   : > { %v934_v18 = vadd.f32 %v1216_v14, %v1536_v51  ;;  %v950_v19 = vadd.f32 %v1264_v15, %v1536_v51 }
 0x11f   : > { %v1218_v20 = vpop.f32.mrf.mxu0  ;;  %v1266_v21 = vpop.f32.mrf.mxu1 }
 0x120   : > { %966 = vst [vmem:[%s1543_s8 + $0x58] sm:$0xff] %v934_v18  ;;  %982 = vst [vmem:[%s1543_s8 + $0xd8] sm:$0xff] %v950_v19  ;;  %v1219_v22 = vadd.f32 %v1218_v20, %v1217_v16  ;;  %v1267_v23 = vadd.f32 %v1266_v21, %v1265_v17 }
 0x121   : > { %v1220_v24 = vpop.f32.mrf.mxu0  ;;  %v1268_v25 = vpop.f32.mrf.mxu1 }
 0x122   : > { %v935_v26 = vadd.f32 %v1219_v22, %v1536_v51  ;;  %v951_v27 = vadd.f32 %v1267_v23, %v1536_v51 }
 0x123   : > { %v1221_v28 = vpop.f32.mrf.mxu0  ;;  %v1269_v29 = vpop.f32.mrf.mxu1 }
 0x124   : > { %967 = vst [vmem:[%s1543_s8 + $0x60] sm:$0xff] %v935_v26  ;;  %983 = vst [vmem:[%s1543_s8 + $0xe0] sm:$0xff] %v951_v27  ;;  %v1222_v30 = vadd.f32 %v1221_v28, %v1220_v24  ;;  %v1270_v31 = vadd.f32 %v1269_v29, %v1268_v25 }
 0x125   : > { %v1223_v32 = vpop.f32.mrf.mxu0  ;;  %v1271_v33 = vpop.f32.mrf.mxu1 }
 0x126   : > { %v936_v34 = vadd.f32 %v1222_v30, %v1536_v51  ;;  %v952_v35 = vadd.f32 %v1270_v31, %v1536_v51 }
 0x127   : > { %v1224_v36 = vpop.f32.mrf.mxu0  ;;  %v1272_v37 = vpop.f32.mrf.mxu1 }
 0x128   : > { %968 = vst [vmem:[%s1543_s8 + $0x68] sm:$0xff] %v936_v34  ;;  %984 = vst [vmem:[%s1543_s8 + $0xe8] sm:$0xff] %v952_v35  ;;  %v1225_v38 = vadd.f32 %v1224_v36, %v1223_v32  ;;  %v1273_v39 = vadd.f32 %v1272_v37, %v1271_v33 }
 0x129   : > { %v1226_v40 = vpop.f32.mrf.mxu0  ;;  %v1274_v41 = vpop.f32.mrf.mxu1 }
 0x12a   : > { %v937_v42 = vadd.f32 %v1225_v38, %v1536_v51  ;;  %v953_v43 = vadd.f32 %v1273_v39, %v1536_v51 }
 0x12b   : > { %v1227_v44 = vpop.f32.mrf.mxu0  ;;  %v1275_v45 = vpop.f32.mrf.mxu1 }
 0x12c   : > { %969 = vst [vmem:[%s1543_s8 + $0x70] sm:$0xff] %v937_v42  ;;  %985 = vst [vmem:[%s1543_s8 + $0xf0] sm:$0xff] %v953_v43  ;;  %v1228_v46 = vadd.f32 %v1227_v44, %v1226_v40  ;;  %v1276_v47 = vadd.f32 %v1275_v45, %v1274_v41 }
 0x12e   : > { %v938_v48 = vadd.f32 %v1228_v46, %v1536_v51  ;;  %v954_v49 = vadd.f32 %v1276_v47, %v1536_v51 }
 0x130   : > { %970 = vst [vmem:[%s1543_s8 + $0x78] sm:$0xff] %v938_v48  ;;  %986 = vst [vmem:[%s1543_s8 + $0xf8] sm:$0xff] %v954_v49 }
 0x131 PF: > { %s13_s14 = sadd.s32 1, %s1403_s14   ;;  %s1622_s12 = smov %s1399_s13 }
 0x132   : > { %p10_p5 = scmp.ge.s32.totalorder %s13_s14, 4   ;;  %s1623_s13 = smov %s1625_s15 }
 0x134   :  { %12 = sbr.rel (!%p10_p5) target bundleno = 2 (0x2), region = 76 }

</bundles_post_ra>
